<compile_context>
chip_gen: v7x
topology: tpu7x:2x2x1
jax: 0.10.0
libtpu: 0.0.40
codegen_flags: <defaults>
</compile_context>

<pallas_src>
import functools

import jax
import jax.numpy as jnp
from jax.experimental import pallas as pl
from jax.experimental.pallas import tpu as pltpu


# ----------------------------------------------------------------------------
# Pallas kernel: grid = (batch_block, head_group).  One step == TB batch elements
# x heads_per_block heads.
# ----------------------------------------------------------------------------
def _eva_attn_kernel(x_ref, wa_ref, ba_ref, wb_ref, bb_ref,
                     wqkv_ref, bqkv_ref, bias_ref, wp_ref, bp_ref,
                     o_ref, xm_ref, acc_ref,
                     *, heads_per_block, non_linear):
    f32 = jnp.float32
    mdt = xm_ref.dtype                       # MXU operand dtype (bf16 or f32)
    TB, Np, C = x_ref.shape
    M = TB * Np
    HG = heads_per_block
    GD = wp_ref.shape[1]                     # HG * D
    D = GD // HG
    Cp = wp_ref.shape[-1]
    g = pl.program_id(1)

    # --- adapter (x + up(act(down(x)))) + accumulator init: only on first group ----
    @pl.when(g == 0)
    def _():
        x = x_ref[...].astype(f32).reshape(M, C)
        h = jnp.dot(x.astype(mdt), wa_ref[...], preferred_element_type=f32) + ba_ref[...]
        if non_linear:                       # SiLU (f32 on VPU/EUP)
            h = h * jax.nn.sigmoid(h)
        up = jnp.dot(h.astype(mdt), wb_ref[...], preferred_element_type=f32) + bb_ref[...]
        xm_ref[...] = (x + up).astype(mdt)   # adapter dropout = identity (eval)
        acc_ref[...] = jnp.zeros_like(acc_ref)

    xm = xm_ref[...]

    # --- fused q|k|v for the whole head group: one (M,C)@(C,3*GD) MXU pass ---------
    qkv = jnp.dot(xm, wqkv_ref[0], preferred_element_type=f32) + bqkv_ref[0]

    # --- attention per head in the group (static lane offsets) ---------------------
    o_heads = []
    for hj in range(HG):
        q = qkv[:, hj * D:(hj + 1) * D].reshape(TB, Np, D).astype(mdt)          # scale pre-folded
        k = qkv[:, GD + hj * D:GD + (hj + 1) * D].reshape(TB, Np, D).astype(mdt)
        v = qkv[:, 2 * GD + hj * D:2 * GD + (hj + 1) * D].reshape(TB, Np, D).astype(mdt)

        s = jnp.einsum('bnd,bmd->bnm', q, k, preferred_element_type=f32)
        s = s + bias_ref[hj].astype(f32)     # rel-pos bias + key-padding mask
        s = s - jnp.max(s, axis=-1, keepdims=True)
        p = jnp.exp(s)
        p = p * pl.reciprocal(jnp.sum(p, axis=-1, keepdims=True), approx=True)

        o = jnp.einsum('bnm,bmd->bnd', p.astype(mdt), v, preferred_element_type=f32)
        o_heads.append(o.reshape(M, D))

    o_group = (o_heads[0] if HG == 1 else jnp.concatenate(o_heads, axis=-1)).astype(mdt)

    # --- projection contribution of this group (K = HG*D depth), accumulate --------
    acc_ref[...] += jnp.dot(o_group, wp_ref[0], preferred_element_type=f32)

    @pl.when(g == pl.num_programs(1) - 1)
    def _():
        o_ref[...] = (acc_ref[...] + bp_ref[...]).reshape(TB, Np, Cp).astype(o_ref.dtype)


# ----------------------------------------------------------------------------
# Relative-position-bias index (glue, plain JAX, matches the PyTorch buffer).
# ----------------------------------------------------------------------------
def _relative_position_index(window_size):
    Wh, Ww = window_size
    num_rel = (2 * Wh - 1) * (2 * Ww - 1) + 3
    coords = jnp.stack(jnp.meshgrid(jnp.arange(Wh), jnp.arange(Ww), indexing="ij"))
    coords_flat = coords.reshape(2, -1)                              # (2, P)
    rel = coords_flat[:, :, None] - coords_flat[:, None, :]          # (2, P, P)
    rel = jnp.transpose(rel, (1, 2, 0))                              # (P, P, 2)
    rel = rel.at[:, :, 0].add(Wh - 1)
    rel = rel.at[:, :, 1].add(Ww - 1)
    rel = rel.at[:, :, 0].multiply(2 * Ww - 1)
    P = Wh * Ww
    idx = jnp.zeros((P + 1, P + 1), dtype=jnp.int32)
    idx = idx.at[1:, 1:].set(rel.sum(-1))
    idx = idx.at[0, :].set(num_rel - 3)
    idx = idx.at[:, 0].set(num_rel - 2)
    idx = idx.at[0, 0].set(num_rel - 1)
    return idx, num_rel


def _default_heads_per_block(num_heads, head_dim):
    """Largest divisor of num_heads with heads_per_block*head_dim <= 256 (MXU depth)."""
    best = 1
    for hg in range(1, num_heads + 1):
        if num_heads % hg == 0 and hg * head_dim <= 256:
            best = hg
    return best


# ----------------------------------------------------------------------------
# One-time parameter preparation (hoist out of the forward path and cache it).
# ----------------------------------------------------------------------------
def prepare_eva_adapter_params(params, *, num_heads, window_size,
                               matmul_dtype=jnp.bfloat16, heads_per_block=None):
    f32 = jnp.float32
    mdt = jnp.dtype(matmul_dtype)
    C = params["qkv_w"].shape[1]
    D = C // num_heads                      # TODO(synk): attn_head_dim override not supported
    scale = D ** (-0.5)
    hid = params["adapter_a_w"].shape[0]
    HG = heads_per_block or _default_heads_per_block(num_heads, D)
    if num_heads % HG != 0:
        raise ValueError("heads_per_block must divide num_heads")
    G = num_heads // HG
    GD = HG * D
    Cp = ((C + 127) // 128) * 128

    # adapter weights (nn.Linear stores (out, in); transpose to (in, out))
    wa = params["adapter_a_w"].T.astype(mdt)                         # (C, hid)
    ba = params["adapter_a_b"].reshape(1, hid).astype(f32)
    wb = params["adapter_b_w"].T.astype(mdt)                         # (hid, C)
    bb = params["adapter_b_b"].reshape(1, C).astype(f32)

    # fused per-group q|k|v weight slabs; qk scale folded into q
    wqkv = params["qkv_w"].T.astype(f32)                             # (C, 3C)
    wq = wqkv[:, :C] * scale
    wk = wqkv[:, C:2 * C]
    wv = wqkv[:, 2 * C:]
    g_slab = lambda w: jnp.transpose(w.reshape(C, G, GD), (1, 0, 2))  # (G, C, GD)
    wqkv_g = jnp.concatenate([g_slab(wq), g_slab(wk), g_slab(wv)], axis=-1).astype(mdt)

    bq = (params["q_bias"].astype(f32) * scale).reshape(G, GD)
    bk = jnp.zeros((G, GD), f32)
    bv = params["v_bias"].astype(f32).reshape(G, GD)
    bqkv_g = jnp.concatenate([bq, bk, bv], axis=-1).reshape(G, 1, 3 * GD)

    # per-group projection rows, output dim padded to Cp (lane-dense store)
    wp = params["proj_w"].T.astype(f32)                              # (H*D, C)
    wp_g = jnp.pad(wp.reshape(G, GD, C), ((0, 0), (0, 0), (0, Cp - C))).astype(mdt)
    bp = jnp.pad(params["proj_b"].astype(f32), (0, Cp - C)).reshape(1, Cp)

    # relative position bias (H, N, N)
    if window_size is not None:
        N = window_size[0] * window_size[1] + 1
        rp_index, _ = _relative_position_index(window_size)
        rpb = params["rel_pos_bias_table"][rp_index.reshape(-1)]
        rpb = rpb.reshape(N, N, num_heads).transpose(2, 0, 1).astype(f32)
    else:
        rpb = None

    return dict(wa=wa, ba=ba, wb=wb, bb=bb, wqkv_g=wqkv_g, bqkv_g=bqkv_g,
                wp_g=wp_g, bp=bp, rpb=rpb,
                num_heads=num_heads, heads_per_block=HG, head_dim=D,
                dim=C, dim_padded=Cp, hidden_dim=hid, matmul_dtype=mdt)


# ----------------------------------------------------------------------------
# Forward pass on prepared parameters.
# batch_blocks: VMEM / pipelining knob (and v7x 2-TC split when even).
# ----------------------------------------------------------------------------
def eva_adapter_attention_prepared(x, prep, *, non_linear=False, rel_pos_bias=None,
                                   batch_blocks=1):
    f32 = jnp.float32
    B, N, C = x.shape
    if C != prep["dim"]:
        raise ValueError("channel mismatch")
    H = prep["num_heads"]
    HG = prep["heads_per_block"]
    D = prep["head_dim"]
    G = H // HG
    GD = HG * D
    Cp = prep["dim_padded"]
    hid = prep["hidden_dim"]
    mdt = prep["matmul_dtype"]

    if B % batch_blocks != 0:
        raise ValueError("batch_blocks must divide the batch size")
    TB = B // batch_blocks
    M = TB * (0)  # placeholder, set below after Np

    pad_mult = 16 if mdt == jnp.dtype(jnp.bfloat16) else 8
    Np = ((N + pad_mult - 1) // pad_mult) * pad_mult
    M = TB * Np

    # relative position bias + optional extra bias + key-padding mask -> (H, Np, Np)
    bias = prep["rpb"] if prep["rpb"] is not None else jnp.zeros((H, N, N), f32)
    if rel_pos_bias is not None:
        # assumes a per-head (H, N, N) bias shared over the batch (as in the module)
        bias = bias + jnp.reshape(rel_pos_bias, (H, N, N)).astype(f32)
    bias = jnp.pad(bias, ((0, 0), (0, Np - N), (0, Np - N)))
    if Np > N:
        bias = bias.at[:, :, N:].set(-1e9)   # mask padded key columns
    bias = bias.astype(mdt if mdt == jnp.dtype(jnp.bfloat16) else f32)

    xp = jnp.pad(x, ((0, 0), (0, Np - N), (0, 0)))

    kernel = functools.partial(_eva_attn_kernel, heads_per_block=HG,
                               non_linear=non_linear)
    const = lambda shape: pl.BlockSpec(shape, lambda i, g: (0,) * len(shape))

    # VMEM budget estimate -> explicit scoped limit (clamped to a range that is safe
    # on v5e / v6e / v7x; shrink TB / raise batch_blocks for very large configs).
    msize = jnp.dtype(mdt).itemsize
    xsize = x.dtype.itemsize
    est = (2 * (TB * Np * C * xsize + TB * Np * Cp * xsize)          # x/out blocks (2-buf)
           + 2 * (C * 3 * GD + GD * Cp) * msize                      # per-group weights (2-buf)
           + 2 * HG * Np * Np * bias.dtype.itemsize                  # bias block (2-buf)
           + (C * hid + hid * C) * msize                             # adapter weights
           + M * C * msize + M * Cp * 4                              # xm + acc scratch
           + (hid + C + Cp + G * 3 * GD) * 4)                        # small biases
    vmem_limit = min(max(int(1.75 * est) + (8 << 20), 32 << 20), 96 << 20)

    flops = (4 * B * Np * C * hid              # adapter down + up
             + 2 * B * Np * C * 3 * C          # fused qkv
             + 4 * B * H * Np * Np * D         # scores + PV
             + 2 * B * Np * C * Cp)            # projection
    transcendentals = B * H * Np * Np + (B * Np * hid if non_linear else 0)
    bytes_accessed = (xp.size * xsize + B * Np * Cp * xsize
                      + bias.size * bias.dtype.itemsize
                      + (3 * C * C + C * Cp + 2 * C * hid) * msize)

    out = pl.pallas_call(
        kernel,
        out_shape=jax.ShapeDtypeStruct((B, Np, Cp), x.dtype),
        grid=(batch_blocks, G),
        in_specs=[
            pl.BlockSpec((TB, Np, C), lambda i, g: (i, 0, 0)),       # x (padded), resident over g
            const((C, hid)), const((1, hid)),                        # adapter A
            const((hid, C)), const((1, C)),                          # adapter B
            pl.BlockSpec((1, C, 3 * GD), lambda i, g: (g, 0, 0)),    # fused qkv weights (group)
            pl.BlockSpec((1, 1, 3 * GD), lambda i, g: (g, 0, 0)),    # fused qkv bias (group)
            pl.BlockSpec((HG, Np, Np), lambda i, g: (g, 0, 0)),      # rel-pos bias + mask (group)
            pl.BlockSpec((1, GD, Cp), lambda i, g: (g, 0, 0)),       # projection rows (group)
            const((1, Cp)),                                          # projection bias
        ],
        out_specs=pl.BlockSpec((TB, Np, Cp), lambda i, g: (i, 0, 0)),
        scratch_shapes=[
            pltpu.VMEM((M, C), mdt),            # xm: adapter output, persists over groups
            pltpu.VMEM((M, Cp), jnp.float32),   # projection accumulator
        ],
        compiler_params=pltpu.CompilerParams(
            dimension_semantics=("parallel", "arbitrary"),
            vmem_limit_bytes=vmem_limit),
        cost_estimate=pl.CostEstimate(flops=flops, transcendentals=transcendentals,
                                      bytes_accessed=bytes_accessed),
    )(xp, prep["wa"], prep["ba"], prep["wb"], prep["bb"],
      prep["wqkv_g"], prep["bqkv_g"], bias, prep["wp_g"], prep["bp"])

    return out[:, :N, :C]


# Convenience wrapper (prepares per call; cache prepare_eva_adapter_params for inference).
def eva_adapter_attention(x, params, *, num_heads, window_size, non_linear=False,
                          rel_pos_bias=None, matmul_dtype=jnp.bfloat16,
                          batch_blocks=1, heads_per_block=None):
    prep = prepare_eva_adapter_params(params, num_heads=num_heads,
                                      window_size=window_size,
                                      matmul_dtype=matmul_dtype,
                                      heads_per_block=heads_per_block)
    return eva_adapter_attention_prepared(x, prep, non_linear=non_linear,
                                          rel_pos_bias=rel_pos_bias,
                                          batch_blocks=batch_blocks)


# ----------------------------------------------------------------------------
# Pure-JAX reference for correctness check.
# ----------------------------------------------------------------------------
def eva_adapter_attention_ref(x, params, *, num_heads, window_size,
                              non_linear=False, rel_pos_bias=None):
    B, N, C = x.shape
    head_dim = C // num_heads
    scale = head_dim ** (-0.5)
    h = x @ params["adapter_a_w"].T + params["adapter_a_b"]
    if non_linear:
        h = h * jax.nn.sigmoid(h)
    x = x + (h @ params["adapter_b_w"].T + params["adapter_b_b"])
    bqkv = jnp.concatenate(
        [params["q_bias"], jnp.zeros_like(params["v_bias"]), params["v_bias"]])
    qkv = x @ params["qkv_w"].T + bqkv
    qkv = qkv.reshape(B, N, 3, num_heads, head_dim).transpose(2, 0, 3, 1, 4)
    q, k, v = qkv[0] * scale, qkv[1], qkv[2]
    attn = q @ jnp.swapaxes(k, -2, -1)
    if window_size is not None:
        rp_index, _ = _relative_position_index(window_size)
        rpb = params["rel_pos_bias_table"][rp_index.reshape(-1)]
        rpb = rpb.reshape(N, N, num_heads).transpose(2, 0, 1)
        attn = attn + rpb[None]
    if rel_pos_bias is not None:
        attn = attn + rel_pos_bias
    attn = jax.nn.softmax(attn, axis=-1)
    out = (attn @ v).transpose(0, 2, 1, 3).reshape(B, N, -1)
    return out @ params["proj_w"].T + params["proj_b"]


if __name__ == "__main__":
    # Small config consistent with the module:
    #   dim=32, num_heads=4 (head_dim=8), window_size=(4,4) => N = 17,
    #   qkv_bias=True, adapter hidden_dim=8, eval mode.
    B, C, H = 2, 32, 4
    window = (4, 4)
    N = window[0] * window[1] + 1
    hid = 8

    key = jax.random.PRNGKey(0)
    ks = jax.random.split(key, 11)
    num_rel = (2 * window[0] - 1) * (2 * window[1] - 1) + 3

    params = {
        "adapter_a_w": 0.02 * jax.random.normal(ks[0], (hid, C), jnp.float32),
        "adapter_a_b": 0.01 * jax.random.normal(ks[1], (hid,), jnp.float32),
        "adapter_b_w": 0.02 * jax.random.normal(ks[2], (C, hid), jnp.float32),
        "adapter_b_b": 0.01 * jax.random.normal(ks[3], (C,), jnp.float32),
        "qkv_w": 0.02 * jax.random.normal(ks[4], (3 * C, C), jnp.float32),
        "q_bias": 0.01 * jax.random.normal(ks[5], (C,), jnp.float32),
        "v_bias": 0.01 * jax.random.normal(ks[6], (C,), jnp.float32),
        "rel_pos_bias_table": 0.02 * jax.random.normal(ks[7], (num_rel, H), jnp.float32),
        "proj_w": 0.02 * jax.random.normal(ks[8], (C, C), jnp.float32),
        "proj_b": 0.01 * jax.random.normal(ks[9], (C,), jnp.float32),
    }

    x = jax.random.normal(ks[10], (B, N, C), jnp.float32)

    # 1) f32 MXU operands, single head group, whole batch in one grid step.
    out = eva_adapter_attention(x, params, num_heads=H, window_size=window,
                                non_linear=False, matmul_dtype=jnp.float32)
    out = jax.block_until_ready(out)
    ref = eva_adapter_attention_ref(x, params, num_heads=H, window_size=window,
                                    non_linear=False)
    assert out.shape == (B, N, C)
    assert jnp.allclose(out, ref, atol=1e-3, rtol=1e-3), "mismatch vs JAX reference (f32)"

    # 2) SiLU adapter + 2 batch blocks + 2 head groups (exercises both grid axes).
    out2 = eva_adapter_attention(x, params, num_heads=H, window_size=window,
                                 non_linear=True, matmul_dtype=jnp.float32,
                                 batch_blocks=2, heads_per_block=2)
    out2 = jax.block_until_ready(out2)
    ref2 = eva_adapter_attention_ref(x, params, num_heads=H, window_size=window,
                                     non_linear=True)
    assert jnp.allclose(out2, ref2, atol=1e-3, rtol=1e-3), "mismatch vs JAX reference (SiLU)"

    # 3) Default bf16 MXU-operand mode via hoisted/prepared params (inference path).
    prep = prepare_eva_adapter_params(params, num_heads=H, window_size=window)
    out3 = eva_adapter_attention_prepared(x, prep, non_linear=False)
    out3 = jax.block_until_ready(out3)
    assert jnp.allclose(out3, ref, atol=2e-2, rtol=2e-2), "mismatch vs JAX reference (bf16)"

    print("KERNEL_OK")
</pallas_src>

<mosaic_0001>
module attributes {stable_mosaic.version = 11 : i64} {
  func.func @_eva_attn_kernel(%arg0: i32, %arg1: i32, %arg2: memref<2x24x32xf32, #tpu.memory_space<vmem>>, %arg3: memref<32x8xf32, #tpu.memory_space<vmem>>, %arg4: memref<1x8xf32, #tpu.memory_space<vmem>>, %arg5: memref<8x32xf32, #tpu.memory_space<vmem>>, %arg6: memref<1x32xf32, #tpu.memory_space<vmem>>, %arg7: memref<1x32x96xf32, #tpu.memory_space<vmem>>, %arg8: memref<1x1x96xf32, #tpu.memory_space<vmem>>, %arg9: memref<4x24x24xf32, #tpu.memory_space<vmem>>, %arg10: memref<1x32x128xf32, #tpu.memory_space<vmem>>, %arg11: memref<1x128xf32, #tpu.memory_space<vmem>>, %arg12: memref<2x24x128xf32, #tpu.memory_space<vmem>>, %arg13: memref<48x32xf32, #tpu.memory_space<vmem>>, %arg14: memref<48x128xf32, #tpu.memory_space<vmem>>) attributes {dimension_semantics = [#tpu.dimension_semantics<parallel>, #tpu.dimension_semantics<arbitrary>], iteration_bounds = array<i64: 1, 1>, scalar_prefetch = 0 : i64, scratch_operands = 2 : i64, tpu.core_type = #tpu.core_type<tc>, window_params = [{transform_indices = @transform_0, window_bounds = array<i64: 2, 24, 32>}, {pipeline_mode = #tpu.pipeline_mode<synchronous>, transform_indices = @transform_1, window_bounds = array<i64: 32, 8>}, {pipeline_mode = #tpu.pipeline_mode<synchronous>, transform_indices = @transform_2, window_bounds = array<i64: 1, 8>}, {pipeline_mode = #tpu.pipeline_mode<synchronous>, transform_indices = @transform_3, window_bounds = array<i64: 8, 32>}, {pipeline_mode = #tpu.pipeline_mode<synchronous>, transform_indices = @transform_4, window_bounds = array<i64: 1, 32>}, {transform_indices = @transform_5, window_bounds = array<i64: 1, 32, 96>}, {transform_indices = @transform_6, window_bounds = array<i64: 1, 1, 96>}, {transform_indices = @transform_7, window_bounds = array<i64: 4, 24, 24>}, {transform_indices = @transform_8, window_bounds = array<i64: 1, 32, 128>}, {pipeline_mode = #tpu.pipeline_mode<synchronous>, transform_indices = @transform_9, window_bounds = array<i64: 1, 128>}, {transform_indices = @transform_10, window_bounds = array<i64: 2, 24, 128>}]} {
    %c0_i32 = arith.constant 0 : i32
    %0 = arith.cmpi eq, %arg1, %c0_i32 : i32
    %1 = arith.extui %0 : i1 to i32
    %c0_i32_0 = arith.constant 0 : i32
    %2 = arith.cmpi ne, %1, %c0_i32_0 : i32
    scf.if %2 {
      %c0_43 = arith.constant 0 : index
      %c0_44 = arith.constant 0 : index
      %c0_45 = arith.constant 0 : index
      %117 = vector.load %arg2[%c0_43, %c0_44, %c0_45] : memref<2x24x32xf32, #tpu.memory_space<vmem>>, vector<2x24x32xf32>
      %118 = vector.shape_cast %117 : vector<2x24x32xf32> to vector<48x32xf32>
      %c0_46 = arith.constant 0 : index
      %c0_47 = arith.constant 0 : index
      %119 = vector.load %arg3[%c0_46, %c0_47] : memref<32x8xf32, #tpu.memory_space<vmem>>, vector<32x8xf32>
      %cst_48 = arith.constant dense<0.000000e+00> : vector<48x8xf32>
      %120 = tpu.matmul %118, %119, %cst_48 {dimension_numbers = #tpu.dot_dimension_numbers<[1], [0], [0], [1], [0, 0, 1, 1], [], []>} : vector<48x32xf32>, vector<32x8xf32>, vector<48x8xf32> -> vector<48x8xf32>
      %c0_49 = arith.constant 0 : index
      %c0_50 = arith.constant 0 : index
      %121 = vector.load %arg4[%c0_49, %c0_50] : memref<1x8xf32, #tpu.memory_space<vmem>>, vector<1x8xf32>
      %122 = vector.broadcast %121 : vector<1x8xf32> to vector<48x8xf32>
      %123 = arith.addf %120, %122 : vector<48x8xf32>
      %c0_51 = arith.constant 0 : index
      %c0_52 = arith.constant 0 : index
      %124 = vector.load %arg5[%c0_51, %c0_52] : memref<8x32xf32, #tpu.memory_space<vmem>>, vector<8x32xf32>
      %cst_53 = arith.constant dense<0.000000e+00> : vector<48x32xf32>
      %125 = tpu.matmul %123, %124, %cst_53 {dimension_numbers = #tpu.dot_dimension_numbers<[1], [0], [0], [1], [0, 0, 1, 1], [], []>} : vector<48x8xf32>, vector<8x32xf32>, vector<48x32xf32> -> vector<48x32xf32>
      %c0_54 = arith.constant 0 : index
      %c0_55 = arith.constant 0 : index
      %126 = vector.load %arg6[%c0_54, %c0_55] : memref<1x32xf32, #tpu.memory_space<vmem>>, vector<1x32xf32>
      %127 = vector.broadcast %126 : vector<1x32xf32> to vector<48x32xf32>
      %128 = arith.addf %125, %127 : vector<48x32xf32>
      %129 = arith.addf %118, %128 : vector<48x32xf32>
      %c0_56 = arith.constant 0 : index
      %c0_57 = arith.constant 0 : index
      %130 = vector.load %arg13[%c0_56, %c0_57] : memref<48x32xf32, #tpu.memory_space<vmem>>, vector<48x32xf32>
      tpu.vector_store %arg13[%c0_56, %c0_57], %129 {strides = array<i32>} : memref<48x32xf32, #tpu.memory_space<vmem>>, vector<48x32xf32>,
      %cst_58 = arith.constant 0.000000e+00 : f32
      %131 = vector.broadcast %cst_58 : f32 to vector<48x128xf32>
      %c0_59 = arith.constant 0 : index
      %c0_60 = arith.constant 0 : index
      %132 = vector.load %arg14[%c0_59, %c0_60] : memref<48x128xf32, #tpu.memory_space<vmem>>, vector<48x128xf32>
      tpu.vector_store %arg14[%c0_59, %c0_60], %131 {strides = array<i32>} : memref<48x128xf32, #tpu.memory_space<vmem>>, vector<48x128xf32>,
    } else {
    }
    %c0 = arith.constant 0 : index
    %c0_1 = arith.constant 0 : index
    %3 = vector.load %arg13[%c0, %c0_1] : memref<48x32xf32, #tpu.memory_space<vmem>>, vector<48x32xf32>
    %c0_2 = arith.constant 0 : index
    %c0_3 = arith.constant 0 : index
    %c0_4 = arith.constant 0 : index
    %4 = vector.load %arg7[%c0_2, %c0_3, %c0_4] : memref<1x32x96xf32, #tpu.memory_space<vmem>>, vector<1x32x96xf32>
    %5 = vector.shape_cast %4 : vector<1x32x96xf32> to vector<32x96xf32>
    %cst = arith.constant dense<0.000000e+00> : vector<48x96xf32>
    %6 = tpu.matmul %3, %5, %cst {dimension_numbers = #tpu.dot_dimension_numbers<[1], [0], [0], [1], [0, 0, 1, 1], [], []>} : vector<48x32xf32>, vector<32x96xf32>, vector<48x96xf32> -> vector<48x96xf32>
    %c0_5 = arith.constant 0 : index
    %c0_6 = arith.constant 0 : index
    %c0_7 = arith.constant 0 : index
    %7 = vector.load %arg8[%c0_5, %c0_6, %c0_7] : memref<1x1x96xf32, #tpu.memory_space<vmem>>, vector<1x1x96xf32>
    %8 = vector.shape_cast %7 : vector<1x1x96xf32> to vector<1x96xf32>
    %9 = vector.broadcast %8 : vector<1x96xf32> to vector<48x96xf32>
    %10 = arith.addf %6, %9 : vector<48x96xf32>
    %11 = vector.extract_strided_slice %10 {offsets = [0, 0], sizes = [48, 8], strides = [1, 1]} : vector<48x96xf32> to vector<48x8xf32>
    %12 = vector.shape_cast %11 : vector<48x8xf32> to vector<2x24x8xf32>
    %13 = vector.extract_strided_slice %10 {offsets = [0, 32], sizes = [48, 8], strides = [1, 1]} : vector<48x96xf32> to vector<48x8xf32>
    %14 = vector.shape_cast %13 : vector<48x8xf32> to vector<2x24x8xf32>
    %15 = vector.extract_strided_slice %10 {offsets = [0, 64], sizes = [48, 8], strides = [1, 1]} : vector<48x96xf32> to vector<48x8xf32>
    %16 = vector.shape_cast %15 : vector<48x8xf32> to vector<2x24x8xf32>
    "tpu.trace_start"() <{level = 10 : i32, message = "bnd,bmd->bnm"}> : () -> ()
    %cst_8 = arith.constant dense<0.000000e+00> : vector<2x24x24xf32>
    %17 = tpu.matmul %12, %14, %cst_8 {dimension_numbers = #tpu.dot_dimension_numbers<[2], [2], [1], [1], [0, 0, 0, 1, 1, 1], [0], [0]>} : vector<2x24x8xf32>, vector<2x24x8xf32>, vector<2x24x24xf32> -> vector<2x24x24xf32>
    "tpu.trace_stop"() : () -> ()
    %c0_9 = arith.constant 0 : index
    %c0_10 = arith.constant 0 : index
    %c0_11 = arith.constant 0 : index
    %18 = vector.load %arg9[%c0_9, %c0_10, %c0_11] : memref<4x24x24xf32, #tpu.memory_space<vmem>>, vector<1x24x24xf32>
    %19 = vector.shape_cast %18 : vector<1x24x24xf32> to vector<24x24xf32>
    %20 = vector.shape_cast %19 : vector<24x24xf32> to vector<1x24x24xf32>
    %21 = vector.broadcast %20 : vector<1x24x24xf32> to vector<2x24x24xf32>
    %22 = arith.addf %17, %21 : vector<2x24x24xf32>
    %cst_12 = arith.constant dense<0xFF800000> : vector<2x24xf32>
    %23 = vector.multi_reduction <maximumf>, %22, %cst_12 [2] : vector<2x24x24xf32> to vector<2x24xf32>
    %24 = vector.shape_cast %23 : vector<2x24xf32> to vector<2x24x1xf32>
    %25 = vector.broadcast %24 : vector<2x24x1xf32> to vector<2x24x24xf32>
    %26 = arith.subf %22, %25 : vector<2x24x24xf32>
    %27 = math.exp %26 : vector<2x24x24xf32>
    %cst_13 = arith.constant dense<0.000000e+00> : vector<2x24xf32>
    %28 = vector.multi_reduction <add>, %27, %cst_13 [2] : vector<2x24x24xf32> to vector<2x24xf32>
    %29 = vector.shape_cast %28 : vector<2x24xf32> to vector<2x24x1xf32>
    %30 = tpu.reciprocal %29 {approx = true} : vector<2x24x1xf32> -> vector<2x24x1xf32>
    %31 = vector.broadcast %30 : vector<2x24x1xf32> to vector<2x24x24xf32>
    %32 = arith.mulf %27, %31 : vector<2x24x24xf32>
    "tpu.trace_start"() <{level = 10 : i32, message = "bnm,bmd->bnd"}> : () -> ()
    %cst_14 = arith.constant dense<0.000000e+00> : vector<2x24x8xf32>
    %33 = tpu.matmul %32, %16, %cst_14 {dimension_numbers = #tpu.dot_dimension_numbers<[2], [1], [1], [2], [0, 0, 0, 1, 1, 2], [0], [0]>} : vector<2x24x24xf32>, vector<2x24x8xf32>, vector<2x24x8xf32> -> vector<2x24x8xf32>
    "tpu.trace_stop"() : () -> ()
    %34 = vector.shape_cast %33 : vector<2x24x8xf32> to vector<48x8xf32>
    %35 = vector.extract_strided_slice %10 {offsets = [0, 8], sizes = [48, 8], strides = [1, 1]} : vector<48x96xf32> to vector<48x8xf32>
    %36 = vector.shape_cast %35 : vector<48x8xf32> to vector<2x24x8xf32>
    %37 = vector.extract_strided_slice %10 {offsets = [0, 40], sizes = [48, 8], strides = [1, 1]} : vector<48x96xf32> to vector<48x8xf32>
    %38 = vector.shape_cast %37 : vector<48x8xf32> to vector<2x24x8xf32>
    %39 = vector.extract_strided_slice %10 {offsets = [0, 72], sizes = [48, 8], strides = [1, 1]} : vector<48x96xf32> to vector<48x8xf32>
    %40 = vector.shape_cast %39 : vector<48x8xf32> to vector<2x24x8xf32>
    "tpu.trace_start"() <{level = 10 : i32, message = "bnd,bmd->bnm"}> : () -> ()
    %cst_15 = arith.constant dense<0.000000e+00> : vector<2x24x24xf32>
    %41 = tpu.matmul %36, %38, %cst_15 {dimension_numbers = #tpu.dot_dimension_numbers<[2], [2], [1], [1], [0, 0, 0, 1, 1, 1], [0], [0]>} : vector<2x24x8xf32>, vector<2x24x8xf32>, vector<2x24x24xf32> -> vector<2x24x24xf32>
    "tpu.trace_stop"() : () -> ()
    %c1 = arith.constant 1 : index
    %c0_16 = arith.constant 0 : index
    %c0_17 = arith.constant 0 : index
    %42 = vector.load %arg9[%c1, %c0_16, %c0_17] : memref<4x24x24xf32, #tpu.memory_space<vmem>>, vector<1x24x24xf32>
    %43 = vector.shape_cast %42 : vector<1x24x24xf32> to vector<24x24xf32>
    %44 = vector.shape_cast %43 : vector<24x24xf32> to vector<1x24x24xf32>
    %45 = vector.broadcast %44 : vector<1x24x24xf32> to vector<2x24x24xf32>
    %46 = arith.addf %41, %45 : vector<2x24x24xf32>
    %cst_18 = arith.constant dense<0xFF800000> : vector<2x24xf32>
    %47 = vector.multi_reduction <maximumf>, %46, %cst_18 [2] : vector<2x24x24xf32> to vector<2x24xf32>
    %48 = vector.shape_cast %47 : vector<2x24xf32> to vector<2x24x1xf32>
    %49 = vector.broadcast %48 : vector<2x24x1xf32> to vector<2x24x24xf32>
    %50 = arith.subf %46, %49 : vector<2x24x24xf32>
    %51 = math.exp %50 : vector<2x24x24xf32>
    %cst_19 = arith.constant dense<0.000000e+00> : vector<2x24xf32>
    %52 = vector.multi_reduction <add>, %51, %cst_19 [2] : vector<2x24x24xf32> to vector<2x24xf32>
    %53 = vector.shape_cast %52 : vector<2x24xf32> to vector<2x24x1xf32>
    %54 = tpu.reciprocal %53 {approx = true} : vector<2x24x1xf32> -> vector<2x24x1xf32>
    %55 = vector.broadcast %54 : vector<2x24x1xf32> to vector<2x24x24xf32>
    %56 = arith.mulf %51, %55 : vector<2x24x24xf32>
    "tpu.trace_start"() <{level = 10 : i32, message = "bnm,bmd->bnd"}> : () -> ()
    %cst_20 = arith.constant dense<0.000000e+00> : vector<2x24x8xf32>
    %57 = tpu.matmul %56, %40, %cst_20 {dimension_numbers = #tpu.dot_dimension_numbers<[2], [1], [1], [2], [0, 0, 0, 1, 1, 2], [0], [0]>} : vector<2x24x24xf32>, vector<2x24x8xf32>, vector<2x24x8xf32> -> vector<2x24x8xf32>
    "tpu.trace_stop"() : () -> ()
    %58 = vector.shape_cast %57 : vector<2x24x8xf32> to vector<48x8xf32>
    %59 = vector.extract_strided_slice %10 {offsets = [0, 16], sizes = [48, 8], strides = [1, 1]} : vector<48x96xf32> to vector<48x8xf32>
    %60 = vector.shape_cast %59 : vector<48x8xf32> to vector<2x24x8xf32>
    %61 = vector.extract_strided_slice %10 {offsets = [0, 48], sizes = [48, 8], strides = [1, 1]} : vector<48x96xf32> to vector<48x8xf32>
    %62 = vector.shape_cast %61 : vector<48x8xf32> to vector<2x24x8xf32>
    %63 = vector.extract_strided_slice %10 {offsets = [0, 80], sizes = [48, 8], strides = [1, 1]} : vector<48x96xf32> to vector<48x8xf32>
    %64 = vector.shape_cast %63 : vector<48x8xf32> to vector<2x24x8xf32>
    "tpu.trace_start"() <{level = 10 : i32, message = "bnd,bmd->bnm"}> : () -> ()
    %cst_21 = arith.constant dense<0.000000e+00> : vector<2x24x24xf32>
    %65 = tpu.matmul %60, %62, %cst_21 {dimension_numbers = #tpu.dot_dimension_numbers<[2], [2], [1], [1], [0, 0, 0, 1, 1, 1], [0], [0]>} : vector<2x24x8xf32>, vector<2x24x8xf32>, vector<2x24x24xf32> -> vector<2x24x24xf32>
    "tpu.trace_stop"() : () -> ()
    %c2 = arith.constant 2 : index
    %c0_22 = arith.constant 0 : index
    %c0_23 = arith.constant 0 : index
    %66 = vector.load %arg9[%c2, %c0_22, %c0_23] : memref<4x24x24xf32, #tpu.memory_space<vmem>>, vector<1x24x24xf32>
    %67 = vector.shape_cast %66 : vector<1x24x24xf32> to vector<24x24xf32>
    %68 = vector.shape_cast %67 : vector<24x24xf32> to vector<1x24x24xf32>
    %69 = vector.broadcast %68 : vector<1x24x24xf32> to vector<2x24x24xf32>
    %70 = arith.addf %65, %69 : vector<2x24x24xf32>
    %cst_24 = arith.constant dense<0xFF800000> : vector<2x24xf32>
    %71 = vector.multi_reduction <maximumf>, %70, %cst_24 [2] : vector<2x24x24xf32> to vector<2x24xf32>
    %72 = vector.shape_cast %71 : vector<2x24xf32> to vector<2x24x1xf32>
    %73 = vector.broadcast %72 : vector<2x24x1xf32> to vector<2x24x24xf32>
    %74 = arith.subf %70, %73 : vector<2x24x24xf32>
    %75 = math.exp %74 : vector<2x24x24xf32>
    %cst_25 = arith.constant dense<0.000000e+00> : vector<2x24xf32>
    %76 = vector.multi_reduction <add>, %75, %cst_25 [2] : vector<2x24x24xf32> to vector<2x24xf32>
    %77 = vector.shape_cast %76 : vector<2x24xf32> to vector<2x24x1xf32>
    %78 = tpu.reciprocal %77 {approx = true} : vector<2x24x1xf32> -> vector<2x24x1xf32>
    %79 = vector.broadcast %78 : vector<2x24x1xf32> to vector<2x24x24xf32>
    %80 = arith.mulf %75, %79 : vector<2x24x24xf32>
    "tpu.trace_start"() <{level = 10 : i32, message = "bnm,bmd->bnd"}> : () -> ()
    %cst_26 = arith.constant dense<0.000000e+00> : vector<2x24x8xf32>
    %81 = tpu.matmul %80, %64, %cst_26 {dimension_numbers = #tpu.dot_dimension_numbers<[2], [1], [1], [2], [0, 0, 0, 1, 1, 2], [0], [0]>} : vector<2x24x24xf32>, vector<2x24x8xf32>, vector<2x24x8xf32> -> vector<2x24x8xf32>
    "tpu.trace_stop"() : () -> ()
    %82 = vector.shape_cast %81 : vector<2x24x8xf32> to vector<48x8xf32>
    %83 = vector.extract_strided_slice %10 {offsets = [0, 24], sizes = [48, 8], strides = [1, 1]} : vector<48x96xf32> to vector<48x8xf32>
    %84 = vector.shape_cast %83 : vector<48x8xf32> to vector<2x24x8xf32>
    %85 = vector.extract_strided_slice %10 {offsets = [0, 56], sizes = [48, 8], strides = [1, 1]} : vector<48x96xf32> to vector<48x8xf32>
    %86 = vector.shape_cast %85 : vector<48x8xf32> to vector<2x24x8xf32>
    %87 = vector.extract_strided_slice %10 {offsets = [0, 88], sizes = [48, 8], strides = [1, 1]} : vector<48x96xf32> to vector<48x8xf32>
    %88 = vector.shape_cast %87 : vector<48x8xf32> to vector<2x24x8xf32>
    "tpu.trace_start"() <{level = 10 : i32, message = "bnd,bmd->bnm"}> : () -> ()
    %cst_27 = arith.constant dense<0.000000e+00> : vector<2x24x24xf32>
    %89 = tpu.matmul %84, %86, %cst_27 {dimension_numbers = #tpu.dot_dimension_numbers<[2], [2], [1], [1], [0, 0, 0, 1, 1, 1], [0], [0]>} : vector<2x24x8xf32>, vector<2x24x8xf32>, vector<2x24x24xf32> -> vector<2x24x24xf32>
    "tpu.trace_stop"() : () -> ()
    %c3 = arith.constant 3 : index
    %c0_28 = arith.constant 0 : index
    %c0_29 = arith.constant 0 : index
    %90 = vector.load %arg9[%c3, %c0_28, %c0_29] : memref<4x24x24xf32, #tpu.memory_space<vmem>>, vector<1x24x24xf32>
    %91 = vector.shape_cast %90 : vector<1x24x24xf32> to vector<24x24xf32>
    %92 = vector.shape_cast %91 : vector<24x24xf32> to vector<1x24x24xf32>
    %93 = vector.broadcast %92 : vector<1x24x24xf32> to vector<2x24x24xf32>
    %94 = arith.addf %89, %93 : vector<2x24x24xf32>
    %cst_30 = arith.constant dense<0xFF800000> : vector<2x24xf32>
    %95 = vector.multi_reduction <maximumf>, %94, %cst_30 [2] : vector<2x24x24xf32> to vector<2x24xf32>
    %96 = vector.shape_cast %95 : vector<2x24xf32> to vector<2x24x1xf32>
    %97 = vector.broadcast %96 : vector<2x24x1xf32> to vector<2x24x24xf32>
    %98 = arith.subf %94, %97 : vector<2x24x24xf32>
    %99 = math.exp %98 : vector<2x24x24xf32>
    %cst_31 = arith.constant dense<0.000000e+00> : vector<2x24xf32>
    %100 = vector.multi_reduction <add>, %99, %cst_31 [2] : vector<2x24x24xf32> to vector<2x24xf32>
    %101 = vector.shape_cast %100 : vector<2x24xf32> to vector<2x24x1xf32>
    %102 = tpu.reciprocal %101 {approx = true} : vector<2x24x1xf32> -> vector<2x24x1xf32>
    %103 = vector.broadcast %102 : vector<2x24x1xf32> to vector<2x24x24xf32>
    %104 = arith.mulf %99, %103 : vector<2x24x24xf32>
    "tpu.trace_start"() <{level = 10 : i32, message = "bnm,bmd->bnd"}> : () -> ()
    %cst_32 = arith.constant dense<0.000000e+00> : vector<2x24x8xf32>
    %105 = tpu.matmul %104, %88, %cst_32 {dimension_numbers = #tpu.dot_dimension_numbers<[2], [1], [1], [2], [0, 0, 0, 1, 1, 2], [0], [0]>} : vector<2x24x24xf32>, vector<2x24x8xf32>, vector<2x24x8xf32> -> vector<2x24x8xf32>
    "tpu.trace_stop"() : () -> ()
    %106 = vector.shape_cast %105 : vector<2x24x8xf32> to vector<48x8xf32>
    %107 = tpu.concatenate %34, %58, %82, %106 in 1 : vector<48x8xf32>, vector<48x8xf32>, vector<48x8xf32>, vector<48x8xf32> -> vector<48x32xf32>
    %c0_33 = arith.constant 0 : index
    %c0_34 = arith.constant 0 : index
    %108 = vector.load %arg14[%c0_33, %c0_34] : memref<48x128xf32, #tpu.memory_space<vmem>>, vector<48x128xf32>
    %c0_35 = arith.constant 0 : index
    %c0_36 = arith.constant 0 : index
    %c0_37 = arith.constant 0 : index
    %109 = vector.load %arg10[%c0_35, %c0_36, %c0_37] : memref<1x32x128xf32, #tpu.memory_space<vmem>>, vector<1x32x128xf32>
    %110 = vector.shape_cast %109 : vector<1x32x128xf32> to vector<32x128xf32>
    %cst_38 = arith.constant dense<0.000000e+00> : vector<48x128xf32>
    %111 = tpu.matmul %107, %110, %cst_38 {dimension_numbers = #tpu.dot_dimension_numbers<[1], [0], [0], [1], [0, 0, 1, 1], [], []>} : vector<48x32xf32>, vector<32x128xf32>, vector<48x128xf32> -> vector<48x128xf32>
    %112 = arith.addf %108, %111 : vector<48x128xf32>
    %c0_39 = arith.constant 0 : index
    %c0_40 = arith.constant 0 : index
    %113 = vector.load %arg14[%c0_39, %c0_40] : memref<48x128xf32, #tpu.memory_space<vmem>>, vector<48x128xf32>
    tpu.vector_store %arg14[%c0_39, %c0_40], %112 {strides = array<i32>} : memref<48x128xf32, #tpu.memory_space<vmem>>, vector<48x128xf32>,
    %c0_i32_41 = arith.constant 0 : i32
    %114 = arith.cmpi eq, %arg1, %c0_i32_41 : i32
    %115 = arith.extui %114 : i1 to i32
    %c0_i32_42 = arith.constant 0 : i32
    %116 = arith.cmpi ne, %115, %c0_i32_42 : i32
    scf.if %116 {
      %c0_43 = arith.constant 0 : index
      %c0_44 = arith.constant 0 : index
      %117 = vector.load %arg14[%c0_43, %c0_44] : memref<48x128xf32, #tpu.memory_space<vmem>>, vector<48x128xf32>
      %c0_45 = arith.constant 0 : index
      %c0_46 = arith.constant 0 : index
      %118 = vector.load %arg11[%c0_45, %c0_46] : memref<1x128xf32, #tpu.memory_space<vmem>>, vector<1x128xf32>
      %119 = vector.broadcast %118 : vector<1x128xf32> to vector<48x128xf32>
      %120 = arith.addf %117, %119 : vector<48x128xf32>
      %121 = vector.shape_cast %120 : vector<48x128xf32> to vector<2x24x128xf32>
      %c0_47 = arith.constant 0 : index
      %c0_48 = arith.constant 0 : index
      %c0_49 = arith.constant 0 : index
      %122 = vector.load %arg12[%c0_47, %c0_48, %c0_49] : memref<2x24x128xf32, #tpu.memory_space<vmem>>, vector<2x24x128xf32>
      tpu.vector_store %arg12[%c0_47, %c0_48, %c0_49], %121 {strides = array<i32>} : memref<2x24x128xf32, #tpu.memory_space<vmem>>, vector<2x24x128xf32>,
    } else {
    }
    return
  }
  func.func @transform_0(%arg0: i32, %arg1: i32) -> (i32, i32, i32) {
    %c0_i32 = arith.constant 0 : i32
    %c0_i32_0 = arith.constant 0 : i32
    %c0_i32_1 = arith.constant 0 : i32
    return %arg0, %c0_i32, %c0_i32_0 : i32, i32, i32
  }
  func.func @transform_1(%arg0: i32, %arg1: i32) -> (i32, i32) {
    %c0_i32 = arith.constant 0 : i32
    %c0_i32_0 = arith.constant 0 : i32
    %c0_i32_1 = arith.constant 0 : i32
    return %c0_i32, %c0_i32_0 : i32, i32
  }
  func.func @transform_2(%arg0: i32, %arg1: i32) -> (i32, i32) {
    %c0_i32 = arith.constant 0 : i32
    %c0_i32_0 = arith.constant 0 : i32
    %c0_i32_1 = arith.constant 0 : i32
    return %c0_i32, %c0_i32_0 : i32, i32
  }
  func.func @transform_3(%arg0: i32, %arg1: i32) -> (i32, i32) {
    %c0_i32 = arith.constant 0 : i32
    %c0_i32_0 = arith.constant 0 : i32
    %c0_i32_1 = arith.constant 0 : i32
    return %c0_i32, %c0_i32_0 : i32, i32
  }
  func.func @transform_4(%arg0: i32, %arg1: i32) -> (i32, i32) {
    %c0_i32 = arith.constant 0 : i32
    %c0_i32_0 = arith.constant 0 : i32
    %c0_i32_1 = arith.constant 0 : i32
    return %c0_i32, %c0_i32_0 : i32, i32
  }
  func.func @transform_5(%arg0: i32, %arg1: i32) -> (i32, i32, i32) {
    %c0_i32 = arith.constant 0 : i32
    %c0_i32_0 = arith.constant 0 : i32
    %c0_i32_1 = arith.constant 0 : i32
    return %arg1, %c0_i32, %c0_i32_0 : i32, i32, i32
  }
  func.func @transform_6(%arg0: i32, %arg1: i32) -> (i32, i32, i32) {
    %c0_i32 = arith.constant 0 : i32
    %c0_i32_0 = arith.constant 0 : i32
    %c0_i32_1 = arith.constant 0 : i32
    return %arg1, %c0_i32, %c0_i32_0 : i32, i32, i32
  }
  func.func @transform_7(%arg0: i32, %arg1: i32) -> (i32, i32, i32) {
    %c0_i32 = arith.constant 0 : i32
    %c0_i32_0 = arith.constant 0 : i32
    %c0_i32_1 = arith.constant 0 : i32
    return %arg1, %c0_i32, %c0_i32_0 : i32, i32, i32
  }
  func.func @transform_8(%arg0: i32, %arg1: i32) -> (i32, i32, i32) {
    %c0_i32 = arith.constant 0 : i32
    %c0_i32_0 = arith.constant 0 : i32
    %c0_i32_1 = arith.constant 0 : i32
    return %arg1, %c0_i32, %c0_i32_0 : i32, i32, i32
  }
  func.func @transform_9(%arg0: i32, %arg1: i32) -> (i32, i32) {
    %c0_i32 = arith.constant 0 : i32
    %c0_i32_0 = arith.constant 0 : i32
    %c0_i32_1 = arith.constant 0 : i32
    return %c0_i32, %c0_i32_0 : i32, i32
  }
  func.func @transform_10(%arg0: i32, %arg1: i32) -> (i32, i32, i32) {
    %c0_i32 = arith.constant 0 : i32
    %c0_i32_0 = arith.constant 0 : i32
    %c0_i32_1 = arith.constant 0 : i32
    return %arg0, %c0_i32, %c0_i32_0 : i32, i32, i32
  }
}

</mosaic_0001>

<bundles_post_ra>
// kernel: tpu_custom_call.1
= control target key start
LH: loop header
LB: loop body
LE: loop exit
PB: predicated region body
PF: predicated region fallthrough
CT: control target
= control target key end

     0   :  { %15 = vsyncpa [#allocation5], 0  ;;  %s4323_s0 = inlined_call_operand.hbm [shape: f32[2,24,32], index: 0, kind: input, shape index: {}]   ;;  %s4324_s1 = inlined_call_operand.vmem [shape: f32[32,8], index: 1, kind: input, shape index: {}]   ;;  %s4325_s2 = inlined_call_operand.vmem [shape: f32[1,8], index: 2, kind: input, shape index: {}]   ;;  %s4326_s3 = inlined_call_operand.hbm [shape: f32[8,32], index: 3, kind: input, shape index: {}]   ;;  %s4327_s4 = inlined_call_operand.vmem [shape: f32[1,32], index: 4, kind: input, shape index: {}]   ;;  %s4328_s5 = inlined_call_operand.vmem [shape: f32[1,32,96], index: 5, kind: input, shape index: {}]   ;;  %s4329_s6 = inlined_call_operand.hbm [shape: f32[1,1,96], index: 6, kind: input, shape index: {}]   ;;  %s4330_s7 = inlined_call_operand.hbm [shape: f32[4,24,24], index: 7, kind: input, shape index: {}]   ;;  %s4331_s8 = inlined_call_operand.vmem [shape: f32[1,32,128], index: 8, kind: input, shape index: {}]   ;;  %s4332_s9 = inlined_call_operand.vmem [shape: f32[1,128], index: 9, kind: input, shape index: {}]   ;;  %s4333_s10 = inlined_call_operand.hbm [shape: f32[2,24,128], index: 10, kind: output, shape index: {}]  }
   0x1   :  { %16 = vsyncpa [#allocation8], 0 }
   0x2   :  { %17 = vsyncpa [#allocation11], 0 }
   0x3   :  { %18 = vsyncpa [#allocation6], 0  ;;  %s3589_s13 = smov [#allocation7]   ;;  %s3590_s15 = smov [#allocation4]  }
   0x4   :  { %s41_s14 = sshll.u32 %s3589_s13, 4  ;;  %s24_s16 = sshll.u32 %s3590_s15, 4  ;;  %s42_s14 = int_to_ptr.vmem [resolvable:$true] %s41_s14  ;;  %s3667_s16 = int_to_ptr.vmem [resolvable:$true] %s24_s16 }
   0x5   :  { %s3471_s19 = scalar_lea.hbm %s4326_s3, 128 }
   0x6   :  { %p3472_p0 = scmp.ne.s32.totalorder %s4326_s3, %s3471_s19  ;;  %p3475_p1 = scmp.lt.u32.totalorder %s3471_s19, %s4326_s3 }
   0x8   :  { %p3477_p2 = pnand %p3475_p1, %p3472_p0 }
   0xa   :  { %3480 = shalt.err (!%p3477_p2)
}
   0xb   :  { %s3481_s24 = scalar_lea.vmem %s42_s14, 128  ;;  %p3486_p4 = scmp.lt.s32.totalorder %s42_s14, %s42_s14 }
   0xc   :  { %p3482_p3 = scmp.ne.s32.totalorder %s42_s14, %s3481_s24  ;;  %p3487_p5 = scmp.lt.s32.totalorder %s3481_s24, %s3481_s24 }
   0xe   :  { %p3488_p6 = por %p3487_p5, %p3486_p4 }
  0x10   :  { %p3489_p7 = pnand %p3488_p6, %p3482_p3 }
  0x12   :  { %3492 = shalt.err (!%p3489_p7)
}
  0x13   :  { %44 = dma.hbm_to_vmem [thread:$0]  %s4326_s3, 128, %s42_s14, [#allocation8]  }
  0x14   :  { %s3493_s29 = scalar_lea.hbm %s4323_s0, 768 }
  0x15   :  { %p3494_p8 = scmp.ne.s32.totalorder %s4323_s0, %s3493_s29  ;;  %p3497_p9 = scmp.lt.u32.totalorder %s3493_s29, %s4323_s0 }
  0x17   :  { %p3499_p10 = pnand %p3497_p9, %p3494_p8 }
  0x19   :  { %3502 = shalt.err (!%p3499_p10)
}
  0x1a   :  { %s3503_s15 = scalar_lea.vmem %s3667_s16, 768  ;;  %p3508_p12 = scmp.lt.s32.totalorder %s3667_s16, %s3667_s16 }
  0x1b   :  { %p3504_p11 = scmp.ne.s32.totalorder %s3667_s16, %s3503_s15  ;;  %p3509_p13 = scmp.lt.s32.totalorder %s3503_s15, %s3503_s15 }
  0x1d   :  { %p3510_p0 = por %p3509_p13, %p3508_p12 }
  0x1f   :  { %p3511_p1 = pnand %p3510_p0, %p3504_p11 }
  0x21   :  { %3514 = shalt.err (!%p3511_p1)
}
  0x22   :  { %s3591_s3 = smov 128   ;;  %s3592_s14 = smov 8  }
  0x23   :  { %30 = dma.hbm_to_vmem [thread:$0]  %s4323_s0, 768, %s3667_s16, [#allocation5], %s3591_s3, %s3591_s3, %s3592_s14  }
  0x24   :  { %s3593_s19 = smov [#allocation9]   ;;  %s3594_s21 = smov [#allocation10]  }
  0x25   :  { %s55_s20 = sshll.u32 %s3593_s19, 4  ;;  %s64_s22 = sshll.u32 %s3594_s21, 4  ;;  %s56_s20 = int_to_ptr.vmem [resolvable:$true] %s55_s20  ;;  %s3701_s22 = int_to_ptr.vmem [resolvable:$true] %s64_s22 }
  0x26   :  { %s3515_s25 = scalar_lea.hbm %s4329_s6, 16 }
  0x27   :  { %p3516_p2 = scmp.ne.s32.totalorder %s4329_s6, %s3515_s25  ;;  %p3519_p3 = scmp.lt.u32.totalorder %s3515_s25, %s4329_s6 }
  0x29   :  { %p3521_p4 = pnand %p3519_p3, %p3516_p2 }
  0x2b   :  { %3524 = shalt.err (!%p3521_p4)
}
  0x2c   :  { %s3525_s0 = scalar_lea.vmem %s56_s20, 16  ;;  %s3529_s16 = scalar_lea.vmem %s56_s20, 32 }
  0x2d   :  { %p3526_p5 = scmp.ne.s32.totalorder %s56_s20, %s3525_s0  ;;  %p3530_p6 = scmp.lt.s32.totalorder %s56_s20, %s56_s20 }
  0x2e   :  { %p3531_p7 = scmp.lt.s32.totalorder %s3529_s16, %s3525_s0 }
  0x30   :  { %p3532_p8 = por %p3531_p7, %p3530_p6 }
  0x32   :  { %p3533_p9 = pnand %p3532_p8, %p3526_p5 }
  0x34   :  { %3536 = shalt.err (!%p3533_p9)
}
  0x35   :  { %58 = dma.hbm_to_vmem [thread:$0]  %s4329_s6, 16, %s56_s20, [#allocation8]  }
  0x36   :  { %s3537_s15 = scalar_lea.hbm %s4330_s7, 1536 }
  0x37   :  { %p3538_p10 = scmp.ne.s32.totalorder %s4330_s7, %s3537_s15  ;;  %p3541_p11 = scmp.lt.u32.totalorder %s3537_s15, %s4330_s7 }
  0x39   :  { %p3543_p12 = pnand %p3541_p11, %p3538_p10 }
  0x3b   :  { %3546 = shalt.err (!%p3543_p12)
}
  0x3c   :  { %s3547_s23 = scalar_lea.vmem %s3701_s22, 1536  ;;  %p3552_p0 = scmp.lt.s32.totalorder %s3701_s22, %s3701_s22 }
  0x3d   :  { %p3548_p13 = scmp.ne.s32.totalorder %s3701_s22, %s3547_s23  ;;  %p3553_p1 = scmp.lt.s32.totalorder %s3547_s23, %s3547_s23 }
  0x3f   :  { %p3554_p2 = por %p3553_p1, %p3552_p0 }
  0x41   :  { %p3555_p3 = pnand %p3554_p2, %p3548_p13 }
  0x43   :  { %3558 = shalt.err (!%p3555_p3)
}
  0x44   :  { %70 = dma.hbm_to_vmem [thread:$0]  %s4330_s7, 1536, %s3701_s22, [#allocation11], %s3591_s3, %s3591_s3, %s3592_s14  }
  0x45   :  { %3581 = dma.done.wait [#allocation5], 768  }
  0x46   :  { %3582 = vsyncadd [#allocation5], 4294966528 }
  0x47   :  { %3583 = dma.done.wait [#allocation8], 144  }
  0x48   :  { %3584 = vsyncadd [#allocation8], 4294967152 }
  0x49   :  { %3585 = dma.done.wait [#allocation11], 1536  }
  0x4a   :  { %3586 = vsyncadd [#allocation11], 4294965760  ;;  %vm108_vm0 = vcmask 261120   ;;  %v97_v0 = vld [vmem:[%s4324_s1] sm:$0xff]  ;;  %v98_v1 = vld [vmem:[%s4324_s1 + $0x8] sm:$0xff]  ;;  %vm230_vm1 = vcmask 64512  }
  0x4b   :  { %v99_v2 = vld [vmem:[%s4324_s1 + $0x10] sm:$0xff]  ;;  %v3192_v3 = vpack.c.bf16 %v98_v1, %v97_v0  ;;  %v100_v4 = vld [vmem:[%s4324_s1 + $0x18] sm:$0xff]  ;;  %v93_v8 = vld [vmem:[#allocation4 + $0x10] sm:$0xff]  ;;  %v3595_v57 = vmov 0.0|0.0   ;;  %vm3597_vm2 = vmmov 0   ;;  %vm699_vm4 = vcmask 195584  }
  0x4c   :  { %v91_v5 = vld [vmem:[#allocation4] sm:$0xff]  ;;  %v3196_v6 = vpack.c.bf16 %v100_v4, %v99_v2  ;;  %v92_v7 = vld [vmem:[#allocation4 + $0x8] sm:$0xff]  ;;  %v94_v9 = vld [vmem:[#allocation4 + $0x18] sm:$0xff]  ;;  %s3600_s21 = smov 88   ;;  %s3601_s23 = smov 120   ;;  %vm2462_vm5 = vcmask 130048  }
  0x4d   :  { %2898 = vmatprep.mubr.msk.f32.mxu0 %vm108_vm0, %v91_v5  ;;  %3193 = vmatprep.subr.bf16.mxu0 %v3192_v3  ;;  %v95_v10 = vld [vmem:[#allocation4 + $0x20] sm:$0xff]  ;;  %v96_v11 = vld [vmem:[#allocation4 + $0x28] sm:$0xff]  ;;  %v222_v12 = vld [vmem:[#allocation7] sm:$0xff]  ;;  %s3602_s6 = smov 56   ;;  %s3603_s20 = smov 80  }
  0x4e   :  { %3195 = vmatpush3.bf16.msra.mxu0 %v3192_v3  ;;  %2907 = vmatprep.subr.mxu1 %v222_v12  ;;  %v2657_v13 = vld [vmem:[%s4325_s2] ss:$0 sm:$0xff]  ;;  %v369_v27 = vld [vmem:[%s4328_s5 + $0x8] sm:$0xff]  ;;  %v370_v29 = vld [vmem:[%s4328_s5 + $0x10] sm:$0xff]  ;;  %v3598_v3 = vmov 0.0   ;;  %s3604_s24 = smov 112  }
  0x4f   :  { %3197 = vmatprep.subr.bf16.mxu0 %v3196_v6  ;;  %2908 = vmatpush3.msra.mxu1 %v222_v12  ;;  %v368_v26 = vld [vmem:[%s4328_s5] sm:$0xff]  ;;  %v371_v30 = vld [vmem:[%s4328_s5 + $0x18] sm:$0xff]  ;;  %v2671_v58 = vld [vmem:[#allocation9] ss:$0 sm:$0xff]  ;;  %s3599_s5 = smov 64   ;;  %s3605_s25 = smov 48  }
  0x50   :  { %v3200_v28 = vpack.c.bf16 %v369_v27, %v368_v26  ;;  %v3204_v31 = vpack.c.bf16 %v371_v30, %v370_v29  ;;  %v2664_v32 = vld [vmem:[%s4327_s4] ss:$0 sm:$0xff]  ;;  %s3596_s4 = smov 96   ;;  %vm3821_vm3 = vmpackc.low %vm230_vm1, %vm230_vm1  ;;  %s3606_s26 = smov 72  }
  0x51   :  { %s3607_s27 = smov 104   ;;  %s3608_s28 = smov 40  }
  0x52   :  { %3199 = vmatpush3.bf16.msra.mxu0 %v3196_v6  ;;  %3201 = vmatprep.subr.bf16.mxu1 %v3200_v28  ;;  %s3609_s29 = smov 16   ;;  %s3610_s12 = smov 24  }
  0x53   :  { %3208 = vmatprep.subr.bf16.mxu0 %v3595_v57  ;;  %s3611_s15 = smov [#allocation12]  }
  0x54   :  { %s2643_s17 = sshll.u32 %s3611_s15, 4  ;;  %s2644_s17 = int_to_ptr.vmem [resolvable:$true] %s2643_s17 }
  0x55   :  { %2899 = vmatmul.mubr.msk.f32.vlgmr.msra.gmra.mrb[0].mxu0 %vm108_vm0, %v92_v7  ;;  %p3564_p5 = scmp.lt.s32.totalorder %s2644_s17, %s2644_s17 }
  0x56   :  { %2901 = vmatprep.mubr.msk.f32.mxu0 %vm108_vm0, %v93_v8 }
  0x59   :  { %2902 = vmatmul.mubr.msk.f32.gmra.mrb[2].mxu0 %vm108_vm0, %v94_v9 }
  0x5a   :  { %2904 = vmatprep.mubr.msk.f32.mxu0 %vm108_vm0, %v95_v10 }
  0x5d   :  { %2905 = vmatmul.mubr.msk.f32.gmra.mrb[4].mxu0 %vm108_vm0, %v96_v11 }
  0x5e   :  { %2941 = vmatprep.mubr.msk.f32.mxu0 %vm3597_vm2, %v3598_v3 }
 0x128   :  { %v2900_v14 = vpop.f32.mrb[0].mxu0 }
 0x129   :  { %v193_v15 = vpop.f32.mrb[1].mxu0  ;;  %v199_v17 = vadd.f32 %v2900_v14, %v2657_v13 }
 0x12a   :  { %v194_v16 = vadd.f32 %v2657_v13, %v193_v15 }
 0x12c   :  { %v2903_v18 = vpop.f32.mrb[2].mxu0  ;;  %2909 = vmatprep.mubr.msk.f32.mxu1 %vm230_vm1, %v194_v16 }
 0x12d   :  { %v203_v19 = vpop.f32.mrb[3].mxu0  ;;  %2910 = vmatmul.mubr.msk.f32.vlgmr.msra.gmra.mrb[0].mxu1 %vm230_vm1, %v199_v17  ;;  %v209_v21 = vadd.f32 %v2903_v18, %v2657_v13 }
 0x12e   :  { %v204_v20 = vadd.f32 %v2657_v13, %v203_v19  ;;  %3203 = vmatpush3.bf16.msra.mxu1 %v3200_v28 }
 0x12f   :  { %3205 = vmatprep.subr.bf16.mxu1 %v3204_v31 }
 0x130   :  { %v2906_v22 = vpop.f32.mrb[4].mxu0  ;;  %2912 = vmatprep.mubr.msk.f32.mxu1 %vm230_vm1, %v204_v20 }
 0x131   :  { %v213_v23 = vpop.f32.mrb[5].mxu0  ;;  %2913 = vmatmul.mubr.msk.f32.gmra.mrb[2].mxu1 %vm230_vm1, %v209_v21  ;;  %v219_v25 = vadd.f32 %v2906_v22, %v2657_v13  ;;  %v493_v21 = vld [vmem:[#allocation10] sm:$0xff] }
 0x132   :  { %v214_v24 = vadd.f32 %v2657_v13, %v213_v23  ;;  %3207 = vmatpush3.bf16.msra.mxu1 %v3204_v31 }
 0x133   :  { %3212 = vmatprep.subr.bf16.mxu1 %v3595_v57 }
 0x134   :  { %2915 = vmatprep.mubr.msk.f32.mxu1 %vm230_vm1, %v214_v24 }
 0x135   :  { %2916 = vmatmul.mubr.msk.f32.gmra.mrb[4].mxu1 %vm230_vm1, %v219_v25  ;;  %v494_v25 = vld [vmem:[#allocation10 + $0x8] sm:$0xff] }
 0x200   :  { %v2911_v33 = vpop.f32.mrb[0].mxu1 }
 0x201   :  { %v321_v34 = vadd.f32 %v2911_v33, %v2664_v32  ;;  %v315_v35 = vpop.f32.mrb[1].mxu1 }
 0x202   :  { %v316_v36 = vadd.f32 %v2664_v32, %v315_v35 }
 0x203   :  { %v345_v37 = vadd.f32 %v321_v34, %v92_v7 }
 0x204   :  { %v344_v38 = vadd.f32 %v316_v36, %v91_v5  ;;  %v2914_v39 = vpop.f32.mrb[2].mxu1 }
 0x205   :  { %351 = vst.msk [vmem:[#allocation2 + $0x8] sm:$0xff] %vm108_vm0, %v345_v37  ;;  %v331_v40 = vadd.f32 %v2914_v39, %v2664_v32  ;;  %v325_v41 = vpop.f32.mrb[3].mxu1 }
 0x206   :  { %350 = vst.msk [vmem:[#allocation2] sm:$0xff] %vm108_vm0, %v344_v38  ;;  %v326_v42 = vadd.f32 %v2664_v32, %v325_v41 }
 0x207   :  { %v347_v43 = vadd.f32 %v331_v40, %v94_v9 }
 0x208   :  { %v346_v44 = vadd.f32 %v326_v42, %v93_v8  ;;  %v2917_v45 = vpop.f32.mrb[4].mxu1 }
 0x209   :  { %353 = vst.msk [vmem:[#allocation2 + $0x18] sm:$0xff] %vm108_vm0, %v347_v43  ;;  %v341_v46 = vadd.f32 %v2917_v45, %v2664_v32  ;;  %v335_v47 = vpop.f32.mrb[5].mxu1 }
 0x20a   :  { %352 = vst.msk [vmem:[#allocation2 + $0x10] sm:$0xff] %vm108_vm0, %v346_v44  ;;  %v336_v48 = vadd.f32 %v2664_v32, %v335_v47  ;;  %v495_v32 = vld [vmem:[#allocation10 + $0x10] sm:$0xff] }
 0x20b   :  { %v349_v49 = vadd.f32 %v341_v46, %v96_v11 }
 0x20c   :  { %v348_v50 = vadd.f32 %v336_v48, %v95_v10  ;;  %v363_v52 = vld [vmem:[#allocation2 + $0x8] sm:$0xff] }
 0x20d   :  { %355 = vst.msk [vmem:[#allocation2 + $0x28] sm:$0xff] %vm108_vm0, %v349_v49  ;;  %v362_v51 = vld [vmem:[#allocation2] sm:$0xff] }
 0x20e   :  { %354 = vst.msk [vmem:[#allocation2 + $0x20] sm:$0xff] %vm108_vm0, %v348_v50  ;;  %2926 = vmatprep.mubr.msk.f32.mxu1 %vm108_vm0, %v362_v51 }
 0x20f   :  { %2927 = vmatmul.mubr.msk.f32.vlgmr.msra.gmra.mrb[6].mxu1 %vm108_vm0, %v363_v52 }
 0x210   :  { %v365_v54 = vld [vmem:[#allocation2 + $0x18] sm:$0xff] }
 0x211   :  { %v364_v53 = vld [vmem:[#allocation2 + $0x10] sm:$0xff] }
 0x212   :  { %2929 = vmatprep.mubr.msk.f32.mxu1 %vm108_vm0, %v364_v53 }
 0x213   :  { %2930 = vmatmul.mubr.msk.f32.gmra.mrb[8].mxu1 %vm108_vm0, %v365_v54 }
 0x214   :  { %v367_v56 = vld [vmem:[#allocation2 + $0x28] sm:$0xff] }
 0x215   :  { %v366_v55 = vld [vmem:[#allocation2 + $0x20] sm:$0xff] }
 0x216   :  { %2932 = vmatprep.mubr.msk.f32.mxu1 %vm108_vm0, %v366_v55 }
 0x217   :  { %2933 = vmatmul.mubr.msk.f32.gmra.mrb[10].mxu1 %vm108_vm0, %v367_v56 }
 0x218   :  { %2956 = vmatprep.mubr.msk.f32.mxu1 %vm3597_vm2, %v3598_v3 }
 0x2e2   :  { %v2928_v59 = vpop.f32.mrb[6].mxu1 }
 0x2e3   :  { %v3791_v60 = vadd.f32 %v2928_v59, %v2671_v58  ;;  %v464_v61 = vpop.f32.mrb[7].mxu1 }
 0x2e4   :  { %v3793_v62 = vadd.f32 %v2671_v58, %v464_v61 }
 0x2e6   :  { %v2931_v63 = vpop.f32.mrb[8].mxu1  ;;  %v3797_v0 = vpack.i.bf16 %v3791_v60, %v3793_v62 }
 0x2e7   :  { %v474_v1 = vpop.f32.mrb[9].mxu1  ;;  %v3809_v7 = vadd.f32 %v2931_v63, %v2671_v58 }
 0x2e8   :  { %v3799_v2 = vadd.f32 %v2671_v58, %v474_v1  ;;  %3296 = vrot.lane.b32.xlu0 %v3797_v0, %s3596_s4 }
 0x2ea   :  { %v2934_v4 = vpop.f32.mrb[10].mxu1  ;;  %503 = vrot.lane.b32.xlu1 %v3799_v2, %s3596_s4 }
 0x2eb   :  { %v3807_v5 = vadd.f32 %v2934_v4, %v2671_v58  ;;  %v484_v6 = vpop.f32.mrb[11].mxu1 }
 0x2ec   :  { %v3811_v8 = vadd.f32 %v2671_v58, %v484_v6 }
 0x2ee   :  { %605 = vrot.lane.b32.xlu1 %v3807_v5, %s3596_s4  ;;  %v3816_v9 = vpack.i.bf16 %v3811_v8, %v3809_v7 }
 0x2f0   :  { %3301 = vrot.lane.b32.xlu0 %v3816_v9, %s3596_s4 }
 0x35a   :  { %v3297_v10 = vpop.permute.xlu0 %3296 }
 0x35b   :  { %v3299_v11 = vunpack.i.h.bf16 %v3297_v10  ;;  %v3298_v12 = vunpack.i.l.bf16 %v3297_v10 }
 0x35c   :  { %v504_v19 = vpop.permute.xlu1 %503 }
 0x35d   :  { %v3209_v14 = vpack.c.bf16 %v3299_v11, %v3298_v12 }
 0x35f   :  { %3211 = vmatpush3.bf16.xpose.msk.msra.mxu0 %vm3821_vm3, %v3209_v14 }
 0x360   :  { %2939 = vmatprep.subr.mxu0 %v3598_v3  ;;  %v606_v20 = vpop.permute.xlu1 %605 }
 0x362   :  { %v3302_v15 = vpop.permute.xlu0 %3301 }
 0x363   :  { %v3304_v16 = vunpack.i.h.bf16 %v3302_v15  ;;  %v3303_v17 = vunpack.i.l.bf16 %v3302_v15 }
 0x365   :  { %v3213_v18 = vpack.c.bf16 %v3304_v16, %v3303_v17 }
 0x367   :  { %2940 = vmatpush3.xpose.msk.msra.mxu0 %vm230_vm1, %v504_v19  ;;  %3215 = vmatpush3.bf16.xpose.msk.msra.mxu1 %vm3821_vm3, %v3213_v18 }
 0x368   :  { %2954 = vmatprep.subr.mxu1 %v3598_v3  ;;  %3216 = vmatprep.subr.bf16.mxu0 %v3595_v57 }
 0x36a   :  { %2942 = vmatmul.mubr.msk.f32.vlgmr.msra.gmra.mrb[6].mxu0 %vm230_vm1, %v3793_v62 }
 0x36b   :  { %2944 = vmatprep.mubr.msk.f32.mxu0 %vm3597_vm2, %v3598_v3 }
 0x36e   :  { %2945 = vmatmul.mubr.msk.f32.gmra.mrb[8].mxu0 %vm230_vm1, %v3791_v60 }
 0x36f   :  { %2955 = vmatpush3.xpose.msk.msra.mxu1 %vm230_vm1, %v606_v20  ;;  %2947 = vmatprep.mubr.msk.f32.mxu0 %vm3597_vm2, %v3598_v3 }
 0x370   :  { %3219 = vmatprep.subr.bf16.mxu1 %v3595_v57 }
 0x372   :  { %2948 = vmatmul.mubr.msk.f32.gmra.mrb[10].mxu0 %vm230_vm1, %v3799_v2  ;;  %2957 = vmatmul.mubr.msk.f32.vlgmr.msra.gmra.mrb[12].mxu1 %vm230_vm1, %v3809_v7 }
 0x373   :  { %2959 = vmatprep.mubr.msk.f32.mxu1 %vm3597_vm2, %v3598_v3  ;;  %2971 = vmatprep.mubr.msk.f32.mxu0 %vm3597_vm2, %v3598_v3 }
 0x376   :  { %2960 = vmatmul.mubr.msk.f32.gmra.mrb[14].mxu1 %vm230_vm1, %v3811_v8 }
 0x377   :  { %2962 = vmatprep.mubr.msk.f32.mxu1 %vm3597_vm2, %v3598_v3 }
 0x37a   :  { %2963 = vmatmul.mubr.msk.f32.gmra.mrb[16].mxu1 %vm230_vm1, %v3807_v5 }
 0x37b   :  { %2986 = vmatprep.mubr.msk.f32.mxu1 %vm3597_vm2, %v3598_v3 }
 0x43d   :  { %v584_v22 = vpop.f32.mrb[6].mxu0 }
 0x43e   :  { %v585_v23 = vadd.f32 %v584_v22, %v493_v21  ;;  %v2943_v24 = vpop.f32.mrb[7].mxu0 }
 0x440   :  { %v700_v26 = vsel %vm699_vm4, %v585_v23, -inf }
 0x441   :  { %701 = vmax.xlane.f32.xlu0 %v700_v26  ;;  %v589_v27 = vpop.f32.mrb[8].mxu0 }
 0x442   :  { %v590_v28 = vadd.f32 %v589_v27, %v494_v25  ;;  %v2946_v29 = vpop.f32.mrb[9].mxu0 }
 0x444   :  { %v703_v30 = vsel %vm699_vm4, %v590_v28, -inf }
 0x445   :  { %v685_v31 = vpop.f32.mrb[12].mxu1  ;;  %704 = vmax.xlane.f32.xlu1 %v703_v30  ;;  %v594_v33 = vpop.f32.mrb[10].mxu0 }
 0x446   :  { %v686_v34 = vadd.f32 %v685_v31, %v493_v21  ;;  %v2949_v35 = vpop.f32.mrb[11].mxu0  ;;  %v2958_v36 = vpop.f32.mrb[13].mxu1  ;;  %v595_v37 = vadd.f32 %v594_v33, %v495_v32 }
 0x448   :  { %v709_v38 = vsel %vm699_vm4, %v686_v34, -inf  ;;  %v706_v43 = vsel %vm699_vm4, %v595_v37, -inf }
 0x449   :  { %v690_v39 = vpop.f32.mrb[14].mxu1  ;;  %710 = vmax.xlane.f32.xlu0 %v709_v38 }
 0x44a   :  { %v691_v40 = vadd.f32 %v690_v39, %v494_v25  ;;  %v2961_v41 = vpop.f32.mrb[15].mxu1 }
 0x44c   :  { %v712_v42 = vsel %vm699_vm4, %v691_v40, -inf }
 0x44d   :  { %v695_v44 = vpop.f32.mrb[16].mxu1  ;;  %713 = vmax.xlane.f32.xlu1 %v712_v42  ;;  %707 = vmax.xlane.f32.xlu0 %v706_v43 }
 0x44e   :  { %v2964_v45 = vpop.f32.mrb[17].mxu1  ;;  %v3874_v46 = vadd.f32 %v695_v44, %v495_v32 }
 0x450   :  { %v715_v47 = vsel %vm699_vm4, %v3874_v46, -inf }
 0x45e   :  { %3306 = vrot.lane.b32.xlu1 %v3797_v0, %s3599_s5 }
 0x462   :  { %770 = vrot.lane.b32.xlu1 %v3799_v2, %s3599_s5 }
 0x463   :  { %3311 = vrot.lane.b32.xlu0 %v3816_v9, %s3599_s5 }
 0x466   :  { %868 = vrot.lane.b32.xlu1 %v3807_v5, %s3599_s5 }
 0x467   :  { %3316 = vrot.lane.b32.xlu0 %v3797_v0, %s3600_s21 }
 0x46a   :  { %3321 = vrot.lane.b32.xlu1 %v3816_v9, %s3600_s21 }
 0x46e   :  { %966 = vrot.lane.b32.xlu1 %v3793_v62, %s3601_s23 }
 0x486   :  { %716 = vmax.xlane.f32.xlu0 %v715_v47 }
 0x49c   :  { %976 = vrot.lane.b32.xlu0 %v3799_v2, %s3600_s21 }
 0x4ce   :  { %v702_v48 = vpop.xlane.xlu0 %701 }
 0x4cf   :  { %v718_v49 = vsub.f32 %v585_v23, %v702_v48 }
 0x4d1   :  { %v724_v50 = vmul.f32 1.442695, %v718_v49 }
 0x4d2   :  { %v705_v51 = vpop.xlane.xlu1 %704 }
 0x4d3   :  { %3375 = vpow2.f32 %v724_v50  ;;  %v719_v52 = vsub.f32 %v590_v28, %v705_v51 }
 0x4d5   :  { %v726_v53 = vmul.f32 1.442695, %v719_v52 }
 0x4d6   :  { %v711_v54 = vpop.xlane.xlu0 %710 }
 0x4d7   :  { %3377 = vpow2.f32 %v726_v53  ;;  %v721_v55 = vsub.f32 %v686_v34, %v711_v54 }
 0x4d9   :  { %v730_v56 = vmul.f32 1.442695, %v721_v55 }
 0x4da   :  { %v714_v58 = vpop.xlane.xlu1 %713  ;;  %v708_v59 = vpop.xlane.xlu0 %707 }
 0x4db   :  { %3379 = vpow2.f32 %v730_v56  ;;  %v722_v61 = vsub.f32 %v691_v40, %v714_v58  ;;  %v720_v63 = vsub.f32 %v595_v37, %v708_v59 }
 0x4dd   :  { %v3880_v1 = vpop.eup %3375  ;;  %v732_v4 = vmul.f32 1.442695, %v722_v61  ;;  %v728_v6 = vmul.f32 1.442695, %v720_v63 }
 0x4de   :  { %v3307_v10 = vpop.permute.xlu1 %3306  ;;  %v3312_v11 = vpop.permute.xlu0 %3311  ;;  %v736_v12 = vsel %vm699_vm4, %v3880_v1, 0.0 }
 0x4df   :  { %3381 = vpow2.f32 %v732_v4  ;;  %v3309_v14 = vunpack.i.h.bf16 %v3307_v10  ;;  %v3308_v15 = vunpack.i.l.bf16 %v3307_v10  ;;  %v3314_v16 = vunpack.i.h.bf16 %v3312_v11  ;;  %737 = vadd.xlane.f32.xlu1 %v736_v12 }
 0x4e0   :  { %3383 = vpow2.f32 %v728_v6  ;;  %v3313_v17 = vunpack.i.l.bf16 %v3312_v11 }
 0x4e1   :  { %v3378_v18 = vpop.eup %3377  ;;  %v3217_v19 = vpack.c.bf16 %v3309_v14, %v3308_v15 }
 0x4e2   :  { %v3220_v20 = vpack.c.bf16 %v3314_v16, %v3313_v17  ;;  %v771_v21 = vpop.permute.xlu1 %770  ;;  %v739_v22 = vsel %vm699_vm4, %v3378_v18, 0.0  ;;  %v3317_v30 = vpop.permute.xlu0 %3316 }
 0x4e3   :  { %3218 = vmatpush3.bf16.msra.mxu0 %v3217_v19  ;;  %740 = vadd.xlane.f32.xlu0 %v739_v22  ;;  %v3319_v42 = vunpack.i.h.bf16 %v3317_v30  ;;  %v3318_v43 = vunpack.i.l.bf16 %v3317_v30  ;;  %v964_v30 = vld [vmem:[#allocation10 + $0x20] sm:$0xff] }
 0x4e4   :  { %3221 = vmatpush3.bf16.msra.mxu1 %v3220_v20  ;;  %2969 = vmatprep.subr.mxu0 %v3598_v3 }
 0x4e5   :  { %v3380_v23 = vpop.eup %3379  ;;  %2984 = vmatprep.subr.mxu1 %v3598_v3  ;;  %v3223_v47 = vpack.c.bf16 %v3319_v42, %v3318_v43 }
 0x4e6   :  { %v869_v24 = vpop.permute.xlu1 %868  ;;  %v745_v25 = vsel %vm699_vm4, %v3380_v23, 0.0 }
 0x4e7   :  { %746 = vadd.xlane.f32.xlu1 %v745_v25  ;;  %2970 = vmatpush3.msra.mxu0 %v771_v21 }
 0x4e8   :  { %2985 = vmatpush3.msra.mxu1 %v869_v24  ;;  %3222 = vmatprep.subr.bf16.mxu0 %v3595_v57 }
 0x4e9   :  { %v3382_v26 = vpop.eup %3381  ;;  %3226 = vmatprep.subr.bf16.mxu1 %v3595_v57 }
 0x4ea   :  { %v3384_v27 = vpop.eup %3383  ;;  %v748_v28 = vsel %vm699_vm4, %v3382_v26, 0.0  ;;  %v3322_v36 = vpop.permute.xlu1 %3321 }
 0x4eb   :  { %749 = vadd.xlane.f32.xlu1 %v748_v28  ;;  %v742_v29 = vsel %vm699_vm4, %v3384_v27, 0.0  ;;  %v3324_v51 = vunpack.i.h.bf16 %v3322_v36  ;;  %v3323_v52 = vunpack.i.l.bf16 %v3322_v36 }
 0x4ec   :  { %743 = vadd.xlane.f32.xlu0 %v742_v29 }
 0x4ed   :  { %v3227_v55 = vpack.c.bf16 %v3324_v51, %v3323_v52 }
 0x4ee   :  { %v967_v37 = vpop.permute.xlu1 %966 }
 0x4fc   :  { %968 = vrot.lane.b32.xlu1 %v3791_v60, %s3601_s23 }
 0x500   :  { %970 = vrot.lane.b32.xlu1 %v3799_v2, %s3601_s23 }
 0x502   :  { %1080 = vrot.lane.b32.xlu0 %v3807_v5, %s3600_s21 }
 0x504   :  { %1074 = vrot.lane.b32.xlu1 %v3807_v5, %s3601_s23 }
 0x513   :  { %v717_v31 = vpop.xlane.xlu0 %716 }
 0x514   :  { %v723_v32 = vsub.f32 %v3874_v46, %v717_v31 }
 0x516   :  { %v734_v33 = vmul.f32 1.442695, %v723_v32 }
 0x517   :  { %v977_v38 = vpop.permute.xlu0 %976 }
 0x518   :  { %3385 = vpow2.f32 %v734_v33 }
 0x522   :  { %v3901_v34 = vpop.eup %3385 }
 0x523   :  { %v751_v35 = vsel %vm699_vm4, %v3901_v34, 0.0 }
 0x524   :  { %752 = vadd.xlane.f32.xlu0 %v751_v35 }
 0x53a   :  { %1070 = vrot.lane.b32.xlu0 %v3809_v7, %s3601_s23 }
 0x53e   :  { %1072 = vrot.lane.b32.xlu0 %v3811_v8, %s3601_s23 }
 0x56c   :  { %v738_v39 = vpop.xlane.xlu1 %737 }
 0x56d   :  { %3387 = vrcp.f32 %v738_v39 }
 0x570   :  { %v741_v40 = vpop.xlane.xlu0 %740 }
 0x571   :  { %3389 = vrcp.f32 %v741_v40  ;;  %v965_v40 = vld [vmem:[#allocation10 + $0x28] sm:$0xff] }
 0x574   :  { %v747_v41 = vpop.xlane.xlu1 %746 }
 0x575   :  { %3391 = vrcp.f32 %v747_v41 }
 0x577   :  { %v3388_v44 = vpop.eup %3387 }
 0x578   :  { %v760_v45 = vmul.f32 %v3388_v44, %v3880_v1  ;;  %v750_v46 = vpop.xlane.xlu1 %749 }
 0x579   :  { %3393 = vrcp.f32 %v750_v46  ;;  %v744_v48 = vpop.xlane.xlu0 %743 }
 0x57a   :  { %3395 = vrcp.f32 %v744_v48  ;;  %2972 = vmatmul.mubr.msk.f32.vlgmr.msra.gmra.mrb[12].mxu0 %vm699_vm4, %v760_v45 }
 0x57b   :  { %v3390_v49 = vpop.eup %3389  ;;  %3225 = vmatpush3.bf16.xpose.msk.msra.mxu0 %vm3821_vm3, %v3223_v47  ;;  %2974 = vmatprep.mubr.msk.f32.mxu0 %vm3597_vm2, %v3598_v3 }
 0x57c   :  { %v761_v50 = vmul.f32 %v3390_v49, %v3378_v18  ;;  %2999 = vmatprep.subr.mxu0 %v3598_v3  ;;  %v969_v1 = vpop.permute.xlu1 %968 }
 0x57d   :  { %v1081_v63 = vpop.permute.xlu0 %1080 }
 0x57e   :  { %2975 = vmatmul.mubr.msk.f32.gmra.mrb[14].mxu0 %vm699_vm4, %v761_v50 }
 0x57f   :  { %v3392_v53 = vpop.eup %3391  ;;  %2977 = vmatprep.mubr.msk.f32.mxu0 %vm3597_vm2, %v3598_v3 }
 0x580   :  { %v763_v54 = vmul.f32 %v3392_v53, %v3380_v23  ;;  %v971_v4 = vpop.permute.xlu1 %970 }
 0x582   :  { %2987 = vmatmul.mubr.msk.f32.vlgmr.msra.gmra.mrb[18].mxu1 %vm699_vm4, %v763_v54 }
 0x583   :  { %v3394_v56 = vpop.eup %3393  ;;  %3000 = vmatpush3.xpose.msk.msra.mxu0 %vm230_vm1, %v977_v38  ;;  %3229 = vmatpush3.bf16.xpose.msk.msra.mxu1 %vm3821_vm3, %v3227_v55 }
 0x584   :  { %v3396_v58 = vpop.eup %3395  ;;  %2989 = vmatprep.mubr.msk.f32.mxu1 %vm3597_vm2, %v3598_v3  ;;  %v764_v59 = vmul.f32 %v3394_v56, %v3382_v26  ;;  %3014 = vmatprep.subr.mxu1 %v3598_v3  ;;  %v1075_v15 = vpop.permute.xlu1 %1074  ;;  %v963_v26 = vld [vmem:[#allocation10 + $0x18] sm:$0xff] }
 0x585   :  { %v762_v61 = vmul.f32 %v3396_v58, %v3384_v27  ;;  %3230 = vmatprep.subr.bf16.mxu0 %v3595_v57 }
 0x586   :  { %2990 = vmatmul.mubr.msk.f32.gmra.mrb[20].mxu1 %vm699_vm4, %v764_v59 }
 0x587   :  { %2978 = vmatmul.mubr.msk.f32.gmra.mrb[16].mxu0 %vm699_vm4, %v762_v61  ;;  %2992 = vmatprep.mubr.msk.f32.mxu1 %vm3597_vm2, %v3598_v3 }
 0x588   :  { %3001 = vmatprep.mubr.msk.f32.mxu0 %vm3597_vm2, %v3598_v3 }
 0x58b   :  { %3002 = vmatmul.mubr.msk.f32.vlgmr.msra.gmra.mrb[18].mxu0 %vm230_vm1, %v967_v37  ;;  %3015 = vmatpush3.xpose.msk.msra.mxu1 %vm230_vm1, %v1081_v63 }
 0x58c   :  { %3004 = vmatprep.mubr.msk.f32.mxu0 %vm3597_vm2, %v3598_v3  ;;  %3233 = vmatprep.subr.bf16.mxu1 %v3595_v57 }
 0x58f   :  { %3005 = vmatmul.mubr.msk.f32.gmra.mrb[20].mxu0 %vm230_vm1, %v969_v1 }
 0x590   :  { %3007 = vmatprep.mubr.msk.f32.mxu0 %vm3597_vm2, %v3598_v3 }
 0x593   :  { %3008 = vmatmul.mubr.msk.f32.gmra.mrb[22].mxu0 %vm230_vm1, %v971_v4 }
 0x594   :  { %3031 = vmatprep.mubr.msk.f32.mxu0 %vm3597_vm2, %v3598_v3 }
 0x5b1   :  { %v753_v6 = vpop.xlane.xlu0 %752 }
 0x5b2   :  { %3397 = vrcp.f32 %v753_v6 }
 0x5b5   :  { %v1071_v12 = vpop.permute.xlu0 %1070 }
 0x5b9   :  { %v1073_v14 = vpop.permute.xlu0 %1072 }
 0x5bc   :  { %v3398_v10 = vpop.eup %3397 }
 0x5bd   :  { %v765_v11 = vmul.f32 %v3398_v10, %v3901_v34 }
 0x5bf   :  { %2993 = vmatmul.mubr.msk.f32.gmra.mrb[22].mxu1 %vm699_vm4, %v765_v11 }
 0x5c0   :  { %3016 = vmatprep.mubr.msk.f32.mxu1 %vm3597_vm2, %v3598_v3 }
 0x5c3   :  { %3017 = vmatmul.mubr.msk.f32.vlgmr.msra.gmra.mrb[24].mxu1 %vm230_vm1, %v1071_v12 }
 0x5c4   :  { %3019 = vmatprep.mubr.msk.f32.mxu1 %vm3597_vm2, %v3598_v3 }
 0x5c7   :  { %3020 = vmatmul.mubr.msk.f32.gmra.mrb[26].mxu1 %vm230_vm1, %v1073_v14 }
 0x5c8   :  { %3022 = vmatprep.mubr.msk.f32.mxu1 %vm3597_vm2, %v3598_v3 }
 0x5cb   :  { %3023 = vmatmul.mubr.msk.f32.gmra.mrb[28].mxu1 %vm230_vm1, %v1075_v15 }
 0x5cc   :  { %3046 = vmatprep.mubr.msk.f32.mxu1 %vm3597_vm2, %v3598_v3 }
 0x64d   :  { %v3957_v16 = vpop.f32.mrb[12].mxu0 }
 0x64e   :  { %v2973_v17 = vpop.f32.mrb[13].mxu0 }
 0x651   :  { %v3959_v18 = vpop.f32.mrb[14].mxu0 }
 0x652   :  { %v2976_v19 = vpop.f32.mrb[15].mxu0 }
 0x655   :  { %v3961_v20 = vpop.f32.mrb[18].mxu1 }
 0x656   :  { %v2988_v21 = vpop.f32.mrb[19].mxu1 }
 0x659   :  { %v3963_v22 = vpop.f32.mrb[20].mxu1 }
 0x65a   :  { %v3965_v23 = vpop.f32.mrb[16].mxu0  ;;  %v2991_v24 = vpop.f32.mrb[21].mxu1 }
 0x65b   :  { %v2979_v25 = vpop.f32.mrb[17].mxu0 }
 0x65e   :  { %v1056_v27 = vpop.f32.mrb[18].mxu0 }
 0x65f   :  { %v1057_v28 = vadd.f32 %v1056_v27, %v963_v26  ;;  %v3003_v29 = vpop.f32.mrb[19].mxu0 }
 0x661   :  { %v1174_v31 = vsel %vm699_vm4, %v1057_v28, -inf }
 0x662   :  { %1175 = vmax.xlane.f32.xlu0 %v1174_v31  ;;  %v1061_v32 = vpop.f32.mrb[20].mxu0 }
 0x663   :  { %v1062_v33 = vadd.f32 %v1061_v32, %v964_v30  ;;  %v3006_v34 = vpop.f32.mrb[21].mxu0 }
 0x665   :  { %v1177_v35 = vsel %vm699_vm4, %v1062_v33, -inf }
 0x666   :  { %1178 = vmax.xlane.f32.xlu1 %v1177_v35  ;;  %v1066_v36 = vpop.f32.mrb[22].mxu0 }
 0x667   :  { %v3009_v37 = vpop.f32.mrb[23].mxu0  ;;  %v1067_v44 = vadd.f32 %v1066_v36, %v965_v40 }
 0x669   :  { %v1180_v50 = vsel %vm699_vm4, %v1067_v44, -inf }
 0x692   :  { %v3969_v38 = vpop.f32.mrb[22].mxu1 }
 0x693   :  { %v2994_v39 = vpop.f32.mrb[23].mxu1 }
 0x696   :  { %v1160_v41 = vpop.f32.mrb[24].mxu1 }
 0x697   :  { %v1161_v42 = vadd.f32 %v1160_v41, %v963_v26  ;;  %v3018_v43 = vpop.f32.mrb[25].mxu1 }
 0x699   :  { %v1183_v45 = vsel %vm699_vm4, %v1161_v42, -inf }
 0x69a   :  { %v1165_v46 = vpop.f32.mrb[26].mxu1  ;;  %1184 = vmax.xlane.f32.xlu0 %v1183_v45 }
 0x69b   :  { %v1166_v47 = vadd.f32 %v1165_v46, %v964_v30  ;;  %v3021_v48 = vpop.f32.mrb[27].mxu1 }
 0x69d   :  { %v1186_v49 = vsel %vm699_vm4, %v1166_v47, -inf }
 0x69e   :  { %v1170_v51 = vpop.f32.mrb[28].mxu1  ;;  %1187 = vmax.xlane.f32.xlu1 %v1186_v49  ;;  %1181 = vmax.xlane.f32.xlu0 %v1180_v50 }
 0x69f   :  { %v3024_v52 = vpop.f32.mrb[29].mxu1  ;;  %v3984_v53 = vadd.f32 %v1170_v51, %v965_v40 }
 0x6a1   :  { %v1189_v54 = vsel %vm699_vm4, %v3984_v53, -inf }
 0x6af   :  { %3326 = vrot.lane.b32.xlu1 %v3797_v0, %s3602_s6 }
 0x6b3   :  { %1244 = vrot.lane.b32.xlu1 %v3799_v2, %s3602_s6 }
 0x6b4   :  { %3331 = vrot.lane.b32.xlu0 %v3816_v9, %s3602_s6 }
 0x6b7   :  { %1342 = vrot.lane.b32.xlu1 %v3807_v5, %s3602_s6 }
 0x6b8   :  { %3336 = vrot.lane.b32.xlu0 %v3797_v0, %s3603_s20 }
 0x6bb   :  { %3341 = vrot.lane.b32.xlu1 %v3816_v9, %s3603_s20 }
 0x6bf   :  { %1440 = vrot.lane.b32.xlu1 %v3793_v62, %s3604_s24 }
 0x6d7   :  { %1190 = vmax.xlane.f32.xlu0 %v1189_v54 }
 0x6ed   :  { %1450 = vrot.lane.b32.xlu0 %v3799_v2, %s3603_s20 }
 0x6ef   :  { %v1176_v55 = vpop.xlane.xlu0 %1175 }
 0x6f0   :  { %v1192_v56 = vsub.f32 %v1057_v28, %v1176_v55 }
 0x6f2   :  { %v1198_v58 = vmul.f32 1.442695, %v1192_v56 }
 0x6f3   :  { %v1179_v59 = vpop.xlane.xlu1 %1178 }
 0x6f4   :  { %3399 = vpow2.f32 %v1198_v58  ;;  %v1193_v61 = vsub.f32 %v1062_v33, %v1179_v59 }
 0x6f6   :  { %v1200_v63 = vmul.f32 1.442695, %v1193_v61 }
 0x6f8   :  { %3401 = vpow2.f32 %v1200_v63 }
 0x6fe   :  { %v3990_v1 = vpop.eup %3399 }
 0x6ff   :  { %v1210_v4 = vsel %vm699_vm4, %v3990_v1, 0.0 }
 0x700   :  { %1211 = vadd.xlane.f32.xlu1 %v1210_v4 }
 0x702   :  { %v3994_v6 = vpop.eup %3401 }
 0x703   :  { %v1213_v10 = vsel %vm699_vm4, %v3994_v6, 0.0 }
 0x70c   :  { %1214 = vadd.xlane.f32.xlu0 %v1213_v10 }
 0x727   :  { %v1185_v11 = vpop.xlane.xlu0 %1184 }
 0x728   :  { %v1195_v12 = vsub.f32 %v1161_v42, %v1185_v11 }
 0x72a   :  { %v1204_v14 = vmul.f32 1.442695, %v1195_v12 }
 0x72b   :  { %v1188_v15 = vpop.xlane.xlu1 %1187  ;;  %v1182_v17 = vpop.xlane.xlu0 %1181 }
 0x72c   :  { %3403 = vpow2.f32 %v1204_v14  ;;  %v1196_v19 = vsub.f32 %v1166_v47, %v1188_v15  ;;  %v1194_v21 = vsub.f32 %v1067_v44, %v1182_v17 }
 0x72e   :  { %v1206_v24 = vmul.f32 1.442695, %v1196_v19  ;;  %v1202_v25 = vmul.f32 1.442695, %v1194_v21 }
 0x72f   :  { %v3327_v26 = vpop.permute.xlu1 %3326  ;;  %v3332_v27 = vpop.permute.xlu0 %3331 }
 0x730   :  { %3405 = vpow2.f32 %v1206_v24  ;;  %v3329_v28 = vunpack.i.h.bf16 %v3327_v26  ;;  %v3328_v29 = vunpack.i.l.bf16 %v3327_v26  ;;  %v3334_v30 = vunpack.i.h.bf16 %v3332_v27 }
 0x731   :  { %3407 = vpow2.f32 %v1202_v25  ;;  %v3333_v31 = vunpack.i.l.bf16 %v3332_v27 }
 0x732   :  { %v3231_v32 = vpack.c.bf16 %v3329_v28, %v3328_v29 }
 0x733   :  { %v3234_v33 = vpack.c.bf16 %v3334_v30, %v3333_v31  ;;  %v1245_v34 = vpop.permute.xlu1 %1244  ;;  %v3337_v43 = vpop.permute.xlu0 %3336 }
 0x734   :  { %3232 = vmatpush3.bf16.msra.mxu0 %v3231_v32  ;;  %v3338_v54 = vunpack.i.l.bf16 %v3337_v43 }
 0x735   :  { %3235 = vmatpush3.bf16.msra.mxu1 %v3234_v33  ;;  %3029 = vmatprep.subr.mxu0 %v3598_v3 }
 0x736   :  { %v3404_v35 = vpop.eup %3403  ;;  %3044 = vmatprep.subr.mxu1 %v3598_v3 }
 0x737   :  { %v1343_v36 = vpop.permute.xlu1 %1342  ;;  %v1219_v37 = vsel %vm699_vm4, %v3404_v35, 0.0 }
 0x738   :  { %1220 = vadd.xlane.f32.xlu1 %v1219_v37  ;;  %3030 = vmatpush3.msra.mxu0 %v1245_v34 }
 0x739   :  { %3045 = vmatpush3.msra.mxu1 %v1343_v36  ;;  %3236 = vmatprep.subr.bf16.mxu0 %v3595_v57 }
 0x73a   :  { %v3406_v39 = vpop.eup %3405  ;;  %3240 = vmatprep.subr.bf16.mxu1 %v3595_v57 }
 0x73b   :  { %v3408_v40 = vpop.eup %3407  ;;  %v1222_v41 = vsel %vm699_vm4, %v3406_v39, 0.0  ;;  %v3342_v49 = vpop.permute.xlu1 %3341 }
 0x73c   :  { %1223 = vadd.xlane.f32.xlu1 %v1222_v41  ;;  %v1216_v42 = vsel %vm699_vm4, %v3408_v40, 0.0  ;;  %v3344_v11 = vunpack.i.h.bf16 %v3342_v49  ;;  %v3343_v12 = vunpack.i.l.bf16 %v3342_v49  ;;  %v1438_v49 = vld [vmem:[#allocation10 + $0x38] sm:$0xff] }
 0x73d   :  { %1217 = vadd.xlane.f32.xlu0 %v1216_v42 }
 0x73e   :  { %v3241_v17 = vpack.c.bf16 %v3344_v11, %v3343_v12 }
 0x73f   :  { %v1441_v50 = vpop.permute.xlu1 %1440 }
 0x74d   :  { %1442 = vrot.lane.b32.xlu1 %v3791_v60, %s3604_s24 }
 0x751   :  { %1444 = vrot.lane.b32.xlu1 %v3799_v2, %s3604_s24 }
 0x753   :  { %1554 = vrot.lane.b32.xlu0 %v3807_v5, %s3603_s20 }
 0x755   :  { %1548 = vrot.lane.b32.xlu1 %v3807_v5, %s3604_s24 }
 0x764   :  { %v1191_v44 = vpop.xlane.xlu0 %1190 }
 0x765   :  { %v1197_v45 = vsub.f32 %v3984_v53, %v1191_v44  ;;  %v3339_v53 = vunpack.i.h.bf16 %v3337_v43 }
 0x767   :  { %v1208_v46 = vmul.f32 1.442695, %v1197_v45  ;;  %v3237_v59 = vpack.c.bf16 %v3339_v53, %v3338_v54  ;;  %v1437_v45 = vld [vmem:[#allocation10 + $0x30] sm:$0xff] }
 0x768   :  { %v1451_v52 = vpop.permute.xlu0 %1450 }
 0x769   :  { %3409 = vpow2.f32 %v1208_v46 }
 0x773   :  { %v4014_v47 = vpop.eup %3409 }
 0x774   :  { %v1225_v48 = vsel %vm699_vm4, %v4014_v47, 0.0 }
 0x775   :  { %1226 = vadd.xlane.f32.xlu0 %v1225_v48 }
 0x78b   :  { %1544 = vrot.lane.b32.xlu0 %v3809_v7, %s3604_s24 }
 0x78d   :  { %v1212_v51 = vpop.xlane.xlu1 %1211 }
 0x78e   :  { %3411 = vrcp.f32 %v1212_v51 }
 0x78f   :  { %1546 = vrot.lane.b32.xlu0 %v3811_v8, %s3604_s24 }
 0x798   :  { %v3412_v55 = vpop.eup %3411 }
 0x799   :  { %v1234_v56 = vmul.f32 %v3412_v55, %v3990_v1  ;;  %v1215_v58 = vpop.xlane.xlu0 %1214 }
 0x79a   :  { %3413 = vrcp.f32 %v1215_v58 }
 0x79b   :  { %3032 = vmatmul.mubr.msk.f32.vlgmr.msra.gmra.mrb[24].mxu0 %vm699_vm4, %v1234_v56 }
 0x79c   :  { %3239 = vmatpush3.bf16.xpose.msk.msra.mxu0 %vm3821_vm3, %v3237_v59  ;;  %3034 = vmatprep.mubr.msk.f32.mxu0 %vm3597_vm2, %v3598_v3 }
 0x79d   :  { %3059 = vmatprep.subr.mxu0 %v3598_v3 }
 0x7a4   :  { %v3414_v61 = vpop.eup %3413  ;;  %3060 = vmatpush3.xpose.msk.msra.mxu0 %vm230_vm1, %v1451_v52 }
 0x7a5   :  { %v1235_v63 = vmul.f32 %v3414_v61, %v3994_v6  ;;  %3244 = vmatprep.subr.bf16.mxu0 %v3595_v57  ;;  %v1439_v61 = vld [vmem:[#allocation10 + $0x40] sm:$0xff] }
 0x7a7   :  { %3035 = vmatmul.mubr.msk.f32.gmra.mrb[26].mxu0 %vm699_vm4, %v1235_v63 }
 0x7a8   :  { %3037 = vmatprep.mubr.msk.f32.mxu0 %vm3597_vm2, %v3598_v3 }
 0x7c5   :  { %v1221_v1 = vpop.xlane.xlu1 %1220 }
 0x7c6   :  { %3415 = vrcp.f32 %v1221_v1 }
 0x7c9   :  { %v1224_v4 = vpop.xlane.xlu1 %1223 }
 0x7ca   :  { %3417 = vrcp.f32 %v1224_v4  ;;  %v1218_v10 = vpop.xlane.xlu0 %1217 }
 0x7cb   :  { %3419 = vrcp.f32 %v1218_v10 }
 0x7cd   :  { %v1443_v26 = vpop.permute.xlu1 %1442 }
 0x7ce   :  { %v1555_v25 = vpop.permute.xlu0 %1554 }
 0x7d0   :  { %v3416_v14 = vpop.eup %3415 }
 0x7d1   :  { %v1237_v15 = vmul.f32 %v3416_v14, %v3404_v35  ;;  %v1445_v27 = vpop.permute.xlu1 %1444 }
 0x7d3   :  { %3047 = vmatmul.mubr.msk.f32.vlgmr.msra.gmra.mrb[30].mxu1 %vm699_vm4, %v1237_v15 }
 0x7d4   :  { %v3418_v6 = vpop.eup %3417  ;;  %3243 = vmatpush3.bf16.xpose.msk.msra.mxu1 %vm3821_vm3, %v3241_v17  ;;  %3049 = vmatprep.mubr.msk.f32.mxu1 %vm3597_vm2, %v3598_v3 }
 0x7d5   :  { %v3420_v19 = vpop.eup %3419  ;;  %v1238_v21 = vmul.f32 %v3418_v6, %v3406_v39  ;;  %3074 = vmatprep.subr.mxu1 %v3598_v3  ;;  %v1549_v33 = vpop.permute.xlu1 %1548 }
 0x7d6   :  { %v1236_v24 = vmul.f32 %v3420_v19, %v3408_v40 }
 0x7d7   :  { %3050 = vmatmul.mubr.msk.f32.gmra.mrb[32].mxu1 %vm699_vm4, %v1238_v21 }
 0x7d8   :  { %3038 = vmatmul.mubr.msk.f32.gmra.mrb[28].mxu0 %vm699_vm4, %v1236_v24  ;;  %3052 = vmatprep.mubr.msk.f32.mxu1 %vm3597_vm2, %v3598_v3 }
 0x7d9   :  { %3061 = vmatprep.mubr.msk.f32.mxu0 %vm3597_vm2, %v3598_v3 }
 0x7dc   :  { %3062 = vmatmul.mubr.msk.f32.vlgmr.msra.gmra.mrb[30].mxu0 %vm230_vm1, %v1441_v50  ;;  %3075 = vmatpush3.xpose.msk.msra.mxu1 %vm230_vm1, %v1555_v25 }
 0x7dd   :  { %3064 = vmatprep.mubr.msk.f32.mxu0 %vm3597_vm2, %v3598_v3  ;;  %3247 = vmatprep.subr.bf16.mxu1 %v3595_v57 }
 0x7e0   :  { %3065 = vmatmul.mubr.msk.f32.gmra.mrb[32].mxu0 %vm230_vm1, %v1443_v26 }
 0x7e1   :  { %3067 = vmatprep.mubr.msk.f32.mxu0 %vm3597_vm2, %v3598_v3 }
 0x7e4   :  { %3068 = vmatmul.mubr.msk.f32.gmra.mrb[34].mxu0 %vm230_vm1, %v1445_v27 }
 0x7e5   :  { %3091 = vmatprep.mubr.msk.f32.mxu0 %vm3597_vm2, %v3598_v3 }
 0x802   :  { %v1227_v28 = vpop.xlane.xlu0 %1226 }
 0x803   :  { %3421 = vrcp.f32 %v1227_v28 }
 0x806   :  { %v1545_v31 = vpop.permute.xlu0 %1544 }
 0x80a   :  { %v1547_v32 = vpop.permute.xlu0 %1546 }
 0x80d   :  { %v3422_v29 = vpop.eup %3421 }
 0x80e   :  { %v1239_v30 = vmul.f32 %v3422_v29, %v4014_v47 }
 0x810   :  { %3053 = vmatmul.mubr.msk.f32.gmra.mrb[34].mxu1 %vm699_vm4, %v1239_v30 }
 0x811   :  { %3076 = vmatprep.mubr.msk.f32.mxu1 %vm3597_vm2, %v3598_v3 }
 0x814   :  { %3077 = vmatmul.mubr.msk.f32.vlgmr.msra.gmra.mrb[36].mxu1 %vm230_vm1, %v1545_v31 }
 0x815   :  { %3079 = vmatprep.mubr.msk.f32.mxu1 %vm3597_vm2, %v3598_v3 }
 0x818   :  { %3080 = vmatmul.mubr.msk.f32.gmra.mrb[38].mxu1 %vm230_vm1, %v1547_v32 }
 0x819   :  { %3082 = vmatprep.mubr.msk.f32.mxu1 %vm3597_vm2, %v3598_v3 }
 0x81c   :  { %3083 = vmatmul.mubr.msk.f32.gmra.mrb[40].mxu1 %vm230_vm1, %v1549_v33 }
 0x81d   :  { %3106 = vmatprep.mubr.msk.f32.mxu1 %vm3597_vm2, %v3598_v3 }
 0x86e   :  { %v4071_v34 = vpop.f32.mrb[24].mxu0 }
 0x86f   :  { %v3033_v35 = vpop.f32.mrb[25].mxu0 }
 0x87a   :  { %v4073_v36 = vpop.f32.mrb[26].mxu0 }
 0x87b   :  { %v3036_v37 = vpop.f32.mrb[27].mxu0 }
 0x8a6   :  { %v4075_v39 = vpop.f32.mrb[30].mxu1 }
 0x8a7   :  { %v3048_v40 = vpop.f32.mrb[31].mxu1 }
 0x8aa   :  { %v4077_v41 = vpop.f32.mrb[32].mxu1 }
 0x8ab   :  { %v4079_v42 = vpop.f32.mrb[28].mxu0  ;;  %v3051_v43 = vpop.f32.mrb[33].mxu1 }
 0x8ac   :  { %v3039_v44 = vpop.f32.mrb[29].mxu0 }
 0x8af   :  { %v1530_v46 = vpop.f32.mrb[30].mxu0 }
 0x8b0   :  { %v1531_v47 = vadd.f32 %v1530_v46, %v1437_v45  ;;  %v3063_v48 = vpop.f32.mrb[31].mxu0 }
 0x8b2   :  { %v1648_v50 = vsel %vm699_vm4, %v1531_v47, -inf }
 0x8b3   :  { %1649 = vmax.xlane.f32.xlu0 %v1648_v50  ;;  %v1535_v51 = vpop.f32.mrb[32].mxu0 }
 0x8b4   :  { %v1536_v52 = vadd.f32 %v1535_v51, %v1438_v49  ;;  %v3066_v53 = vpop.f32.mrb[33].mxu0 }
 0x8b6   :  { %v1651_v54 = vsel %vm699_vm4, %v1536_v52, -inf }
 0x8b7   :  { %1652 = vmax.xlane.f32.xlu1 %v1651_v54  ;;  %v1540_v55 = vpop.f32.mrb[34].mxu0 }
 0x8b8   :  { %v3069_v56 = vpop.f32.mrb[35].mxu0  ;;  %v1541_v10 = vadd.f32 %v1540_v55, %v1439_v61 }
 0x8ba   :  { %v1654_v6 = vsel %vm699_vm4, %v1541_v10, -inf }
 0x8e3   :  { %v4083_v58 = vpop.f32.mrb[34].mxu1 }
 0x8e4   :  { %v3054_v59 = vpop.f32.mrb[35].mxu1 }
 0x8e7   :  { %v1634_v63 = vpop.f32.mrb[36].mxu1 }
 0x8e8   :  { %v1635_v1 = vadd.f32 %v1634_v63, %v1437_v45  ;;  %v3078_v4 = vpop.f32.mrb[37].mxu1 }
 0x8ea   :  { %v1657_v11 = vsel %vm699_vm4, %v1635_v1, -inf }
 0x8eb   :  { %v1639_v12 = vpop.f32.mrb[38].mxu1  ;;  %1658 = vmax.xlane.f32.xlu0 %v1657_v11 }
 0x8ec   :  { %v1640_v14 = vadd.f32 %v1639_v12, %v1438_v49  ;;  %v3081_v15 = vpop.f32.mrb[39].mxu1 }
 0x8ee   :  { %v1660_v17 = vsel %vm699_vm4, %v1640_v14, -inf }
 0x8ef   :  { %v1644_v19 = vpop.f32.mrb[40].mxu1  ;;  %1661 = vmax.xlane.f32.xlu1 %v1660_v17  ;;  %1655 = vmax.xlane.f32.xlu0 %v1654_v6 }
 0x8f0   :  { %v3084_v21 = vpop.f32.mrb[41].mxu1  ;;  %v4098_v24 = vadd.f32 %v1644_v19, %v1439_v61 }
 0x8f2   :  { %v1663_v25 = vsel %vm699_vm4, %v4098_v24, -inf }
 0x900   :  { %3346 = vrot.lane.b32.xlu1 %v3797_v0, %s3605_s25 }
 0x904   :  { %1718 = vrot.lane.b32.xlu1 %v3799_v2, %s3605_s25 }
 0x905   :  { %3351 = vrot.lane.b32.xlu0 %v3816_v9, %s3605_s25 }
 0x908   :  { %1816 = vrot.lane.b32.xlu1 %v3807_v5, %s3605_s25 }
 0x909   :  { %3356 = vrot.lane.b32.xlu0 %v3797_v0, %s3606_s26 }
 0x90c   :  { %3361 = vrot.lane.b32.xlu1 %v3816_v9, %s3606_s26 }
 0x910   :  { %1914 = vrot.lane.b32.xlu1 %v3793_v62, %s3607_s27 }
 0x928   :  { %1664 = vmax.xlane.f32.xlu0 %v1663_v25 }
 0x93e   :  { %1924 = vrot.lane.b32.xlu0 %v3799_v2, %s3606_s26 }
 0x940   :  { %v1650_v26 = vpop.xlane.xlu0 %1649 }
 0x941   :  { %v1666_v27 = vsub.f32 %v1531_v47, %v1650_v26 }
 0x943   :  { %v1672_v28 = vmul.f32 1.442695, %v1666_v27 }
 0x944   :  { %v1653_v29 = vpop.xlane.xlu1 %1652 }
 0x945   :  { %3423 = vpow2.f32 %v1672_v28  ;;  %v1667_v30 = vsub.f32 %v1536_v52, %v1653_v29 }
 0x947   :  { %v1674_v31 = vmul.f32 1.442695, %v1667_v30 }
 0x949   :  { %3425 = vpow2.f32 %v1674_v31 }
 0x94f   :  { %v4104_v32 = vpop.eup %3423 }
 0x950   :  { %v1684_v62 = vsel %vm699_vm4, %v4104_v32, 0.0 }
 0x951   :  { %1685 = vadd.xlane.f32.xlu1 %v1684_v62 }
 0x953   :  { %v4108_v33 = vpop.eup %3425 }
 0x954   :  { %v1687_v35 = vsel %vm699_vm4, %v4108_v33, 0.0 }
 0x95d   :  { %1688 = vadd.xlane.f32.xlu0 %v1687_v35 }
 0x978   :  { %v1659_v37 = vpop.xlane.xlu0 %1658 }
 0x979   :  { %v1669_v40 = vsub.f32 %v1635_v1, %v1659_v37 }
 0x97b   :  { %v1678_v43 = vmul.f32 1.442695, %v1669_v40 }
 0x97c   :  { %v1662_v44 = vpop.xlane.xlu1 %1661  ;;  %v1656_v45 = vpop.xlane.xlu0 %1655 }
 0x97d   :  { %3427 = vpow2.f32 %v1678_v43  ;;  %v1670_v46 = vsub.f32 %v1640_v14, %v1662_v44  ;;  %v1668_v47 = vsub.f32 %v1541_v10, %v1656_v45 }
 0x97f   :  { %v1680_v48 = vmul.f32 1.442695, %v1670_v46  ;;  %v1676_v49 = vmul.f32 1.442695, %v1668_v47 }
 0x980   :  { %v3347_v50 = vpop.permute.xlu1 %3346  ;;  %v3352_v51 = vpop.permute.xlu0 %3351 }
 0x981   :  { %3429 = vpow2.f32 %v1680_v48  ;;  %v3349_v52 = vunpack.i.h.bf16 %v3347_v50  ;;  %v3348_v53 = vunpack.i.l.bf16 %v3347_v50  ;;  %v3354_v54 = vunpack.i.h.bf16 %v3352_v51 }
 0x982   :  { %3431 = vpow2.f32 %v1676_v49  ;;  %v3353_v55 = vunpack.i.l.bf16 %v3352_v51 }
 0x983   :  { %v3245_v56 = vpack.c.bf16 %v3349_v52, %v3348_v53 }
 0x984   :  { %v3248_v59 = vpack.c.bf16 %v3354_v54, %v3353_v55  ;;  %v1719_v61 = vpop.permute.xlu1 %1718  ;;  %v3357_v15 = vpop.permute.xlu0 %3356 }
 0x985   :  { %3246 = vmatpush3.bf16.msra.mxu0 %v3245_v56  ;;  %v3358_v29 = vunpack.i.l.bf16 %v3357_v15 }
 0x986   :  { %3249 = vmatpush3.bf16.msra.mxu1 %v3248_v59  ;;  %3089 = vmatprep.subr.mxu0 %v3598_v3 }
 0x987   :  { %v3428_v63 = vpop.eup %3427  ;;  %3104 = vmatprep.subr.mxu1 %v3598_v3 }
 0x988   :  { %v1817_v1 = vpop.permute.xlu1 %1816  ;;  %v1693_v4 = vsel %vm699_vm4, %v3428_v63, 0.0 }
 0x989   :  { %1694 = vadd.xlane.f32.xlu1 %v1693_v4  ;;  %3090 = vmatpush3.msra.mxu0 %v1719_v61 }
 0x98a   :  { %3105 = vmatpush3.msra.mxu1 %v1817_v1  ;;  %3250 = vmatprep.subr.bf16.mxu0 %v3595_v57 }
 0x98b   :  { %v3430_v10 = vpop.eup %3429  ;;  %3254 = vmatprep.subr.bf16.mxu1 %v3595_v57 }
 0x98c   :  { %v3432_v11 = vpop.eup %3431  ;;  %v1696_v12 = vsel %vm699_vm4, %v3430_v10, 0.0  ;;  %v3362_v25 = vpop.permute.xlu1 %3361 }
 0x98d   :  { %1697 = vadd.xlane.f32.xlu1 %v1696_v12  ;;  %v1690_v14 = vsel %vm699_vm4, %v3432_v11, 0.0  ;;  %v3364_v43 = vunpack.i.h.bf16 %v3362_v25  ;;  %v3363_v44 = vunpack.i.l.bf16 %v3362_v25  ;;  %v1912_v25 = vld [vmem:[#allocation10 + $0x50] sm:$0xff] }
 0x98e   :  { %1691 = vadd.xlane.f32.xlu0 %v1690_v14 }
 0x98f   :  { %v3255_v47 = vpack.c.bf16 %v3364_v43, %v3363_v44 }
 0x990   :  { %v1915_v26 = vpop.permute.xlu1 %1914 }
 0x99e   :  { %1916 = vrot.lane.b32.xlu1 %v3791_v60, %s3607_s27 }
 0x9a2   :  { %1918 = vrot.lane.b32.xlu1 %v3799_v2, %s3607_s27 }
 0x9a4   :  { %2028 = vrot.lane.b32.xlu0 %v3807_v5, %s3606_s26 }
 0x9a6   :  { %2022 = vrot.lane.b32.xlu1 %v3807_v5, %s3607_s27 }
 0x9b5   :  { %v1665_v17 = vpop.xlane.xlu0 %1664 }
 0x9b6   :  { %v1671_v6 = vsub.f32 %v4098_v24, %v1665_v17  ;;  %v3359_v24 = vunpack.i.h.bf16 %v3357_v15 }
 0x9b8   :  { %v1682_v19 = vmul.f32 1.442695, %v1671_v6  ;;  %v3251_v35 = vpack.c.bf16 %v3359_v24, %v3358_v29  ;;  %v1911_v6 = vld [vmem:[#allocation10 + $0x48] sm:$0xff] }
 0x9b9   :  { %v1925_v28 = vpop.permute.xlu0 %1924 }
 0x9ba   :  { %3433 = vpow2.f32 %v1682_v19 }
 0x9c4   :  { %v4128_v21 = vpop.eup %3433 }
 0x9c5   :  { %v1699_v60 = vsel %vm699_vm4, %v4128_v21, 0.0 }
 0x9c6   :  { %1700 = vadd.xlane.f32.xlu0 %v1699_v60 }
 0x9dc   :  { %2018 = vrot.lane.b32.xlu0 %v3809_v7, %s3607_s27 }
 0x9de   :  { %v1686_v27 = vpop.xlane.xlu1 %1685 }
 0x9df   :  { %3435 = vrcp.f32 %v1686_v27 }
 0x9e0   :  { %2020 = vrot.lane.b32.xlu0 %v3811_v8, %s3607_s27 }
 0x9e9   :  { %v3436_v30 = vpop.eup %3435 }
 0x9ea   :  { %v1708_v31 = vmul.f32 %v3436_v30, %v4104_v32  ;;  %v1689_v62 = vpop.xlane.xlu0 %1688 }
 0x9eb   :  { %3437 = vrcp.f32 %v1689_v62 }
 0x9ec   :  { %3092 = vmatmul.mubr.msk.f32.vlgmr.msra.gmra.mrb[36].mxu0 %vm699_vm4, %v1708_v31 }
 0x9ed   :  { %3253 = vmatpush3.bf16.xpose.msk.msra.mxu0 %vm3821_vm3, %v3251_v35  ;;  %3094 = vmatprep.mubr.msk.f32.mxu0 %vm3597_vm2, %v3598_v3 }
 0x9ee   :  { %3119 = vmatprep.subr.mxu0 %v3598_v3 }
 0x9f5   :  { %v3438_v7 = vpop.eup %3437  ;;  %3120 = vmatpush3.xpose.msk.msra.mxu0 %vm230_vm1, %v1925_v28 }
 0x9f6   :  { %v1709_v8 = vmul.f32 %v3438_v7, %v4108_v33  ;;  %3258 = vmatprep.subr.bf16.mxu0 %v3595_v57  ;;  %v1913_v7 = vld [vmem:[#allocation10 + $0x58] sm:$0xff] }
 0x9f8   :  { %3095 = vmatmul.mubr.msk.f32.gmra.mrb[38].mxu0 %vm699_vm4, %v1709_v8 }
 0x9f9   :  { %3097 = vmatprep.mubr.msk.f32.mxu0 %vm3597_vm2, %v3598_v3 }
 0xa16   :  { %v1695_v32 = vpop.xlane.xlu1 %1694 }
 0xa17   :  { %3439 = vrcp.f32 %v1695_v32 }
 0xa1a   :  { %v1698_v37 = vpop.xlane.xlu1 %1697 }
 0xa1b   :  { %3441 = vrcp.f32 %v1698_v37  ;;  %v1692_v40 = vpop.xlane.xlu0 %1691 }
 0xa1c   :  { %3443 = vrcp.f32 %v1692_v40 }
 0xa1e   :  { %v1917_v51 = vpop.permute.xlu1 %1916 }
 0xa1f   :  { %v2029_v13 = vpop.permute.xlu0 %2028 }
 0xa21   :  { %v3440_v45 = vpop.eup %3439 }
 0xa22   :  { %v1711_v46 = vmul.f32 %v3440_v45, %v3428_v63  ;;  %v1919_v52 = vpop.permute.xlu1 %1918 }
 0xa24   :  { %3107 = vmatmul.mubr.msk.f32.vlgmr.msra.gmra.mrb[42].mxu1 %vm699_vm4, %v1711_v46 }
 0xa25   :  { %v3442_v33 = vpop.eup %3441  ;;  %3257 = vmatpush3.bf16.xpose.msk.msra.mxu1 %vm3821_vm3, %v3255_v47  ;;  %3109 = vmatprep.mubr.msk.f32.mxu1 %vm3597_vm2, %v3598_v3 }
 0xa26   :  { %v3444_v48 = vpop.eup %3443  ;;  %v1712_v49 = vmul.f32 %v3442_v33, %v3430_v10  ;;  %3134 = vmatprep.subr.mxu1 %v3598_v3  ;;  %v2023_v59 = vpop.permute.xlu1 %2022 }
 0xa27   :  { %v1710_v50 = vmul.f32 %v3444_v48, %v3432_v11 }
 0xa28   :  { %3110 = vmatmul.mubr.msk.f32.gmra.mrb[44].mxu1 %vm699_vm4, %v1712_v49 }
 0xa29   :  { %3098 = vmatmul.mubr.msk.f32.gmra.mrb[40].mxu0 %vm699_vm4, %v1710_v50  ;;  %3112 = vmatprep.mubr.msk.f32.mxu1 %vm3597_vm2, %v3598_v3 }
 0xa2a   :  { %3121 = vmatprep.mubr.msk.f32.mxu0 %vm3597_vm2, %v3598_v3 }
 0xa2d   :  { %3122 = vmatmul.mubr.msk.f32.vlgmr.msra.gmra.mrb[42].mxu0 %vm230_vm1, %v1915_v26  ;;  %3135 = vmatpush3.xpose.msk.msra.mxu1 %vm230_vm1, %v2029_v13 }
 0xa2e   :  { %3124 = vmatprep.mubr.msk.f32.mxu0 %vm3597_vm2, %v3598_v3  ;;  %3261 = vmatprep.subr.bf16.mxu1 %v3595_v57 }
 0xa31   :  { %3125 = vmatmul.mubr.msk.f32.gmra.mrb[44].mxu0 %vm230_vm1, %v1917_v51 }
 0xa32   :  { %3127 = vmatprep.mubr.msk.f32.mxu0 %vm3597_vm2, %v3598_v3 }
 0xa35   :  { %3128 = vmatmul.mubr.msk.f32.gmra.mrb[46].mxu0 %vm230_vm1, %v1919_v52 }
 0xa36   :  { %3151 = vmatprep.mubr.msk.f32.mxu0 %vm3597_vm2, %v3598_v3 }
 0xa53   :  { %v1701_v53 = vpop.xlane.xlu0 %1700 }
 0xa54   :  { %3445 = vrcp.f32 %v1701_v53 }
 0xa57   :  { %v2019_v56 = vpop.permute.xlu0 %2018 }
 0xa5b   :  { %v2021_v57 = vpop.permute.xlu0 %2020 }
 0xa5e   :  { %v3446_v54 = vpop.eup %3445 }
 0xa5f   :  { %v1713_v55 = vmul.f32 %v3446_v54, %v4128_v21 }
 0xa61   :  { %3113 = vmatmul.mubr.msk.f32.gmra.mrb[46].mxu1 %vm699_vm4, %v1713_v55 }
 0xa62   :  { %3136 = vmatprep.mubr.msk.f32.mxu1 %vm3597_vm2, %v3598_v3 }
 0xa65   :  { %3137 = vmatmul.mubr.msk.f32.vlgmr.msra.gmra.mrb[48].mxu1 %vm230_vm1, %v2019_v56 }
 0xa66   :  { %3139 = vmatprep.mubr.msk.f32.mxu1 %vm3597_vm2, %v3598_v3 }
 0xa69   :  { %3140 = vmatmul.mubr.msk.f32.gmra.mrb[50].mxu1 %vm230_vm1, %v2021_v57 }
 0xa6a   :  { %3142 = vmatprep.mubr.msk.f32.mxu1 %vm3597_vm2, %v3598_v3 }
 0xa6d   :  { %3143 = vmatmul.mubr.msk.f32.gmra.mrb[52].mxu1 %vm230_vm1, %v2023_v59 }
 0xa6e   :  { %3166 = vmatprep.mubr.msk.f32.mxu1 %vm3597_vm2, %v3598_v3 }
 0xabf   :  { %v4185_v61 = vpop.f32.mrb[36].mxu0 }
 0xac0   :  { %v3093_v63 = vpop.f32.mrb[37].mxu0 }
 0xacb   :  { %v4187_v1 = vpop.f32.mrb[38].mxu0 }
 0xacc   :  { %v3096_v4 = vpop.f32.mrb[39].mxu0 }
 0xaf7   :  { %v4189_v10 = vpop.f32.mrb[42].mxu1 }
 0xaf8   :  { %v3108_v11 = vpop.f32.mrb[43].mxu1 }
 0xafb   :  { %v4191_v12 = vpop.f32.mrb[44].mxu1 }
 0xafc   :  { %v4193_v14 = vpop.f32.mrb[40].mxu0  ;;  %v3111_v15 = vpop.f32.mrb[45].mxu1 }
 0xafd   :  { %v3099_v17 = vpop.f32.mrb[41].mxu0 }
 0xb00   :  { %v2004_v19 = vpop.f32.mrb[42].mxu0 }
 0xb01   :  { %v2005_v21 = vadd.f32 %v2004_v19, %v1911_v6  ;;  %v3123_v60 = vpop.f32.mrb[43].mxu0 }
 0xb03   :  { %v2122_v26 = vsel %vm699_vm4, %v2005_v21, -inf }
 0xb04   :  { %2123 = vmax.xlane.f32.xlu0 %v2122_v26  ;;  %v2009_v27 = vpop.f32.mrb[44].mxu0 }
 0xb05   :  { %v2010_v28 = vadd.f32 %v2009_v27, %v1912_v25  ;;  %v3126_v24 = vpop.f32.mrb[45].mxu0 }
 0xb07   :  { %v2125_v29 = vsel %vm699_vm4, %v2010_v28, -inf }
 0xb08   :  { %2126 = vmax.xlane.f32.xlu1 %v2125_v29  ;;  %v2014_v30 = vpop.f32.mrb[46].mxu0 }
 0xb09   :  { %v3129_v31 = vpop.f32.mrb[47].mxu0  ;;  %v2015_v40 = vadd.f32 %v2014_v30, %v1913_v7 }
 0xb0b   :  { %v2128_v33 = vsel %vm699_vm4, %v2015_v40, -inf }
 0xb34   :  { %v4197_v62 = vpop.f32.mrb[46].mxu1 }
 0xb35   :  { %v3114_v35 = vpop.f32.mrb[47].mxu1 }
 0xb38   :  { %v2108_v8 = vpop.f32.mrb[48].mxu1 }
 0xb39   :  { %v2109_v32 = vadd.f32 %v2108_v8, %v1911_v6  ;;  %v3138_v37 = vpop.f32.mrb[49].mxu1 }
 0xb3b   :  { %v2131_v43 = vsel %vm699_vm4, %v2109_v32, -inf }
 0xb3c   :  { %v2113_v44 = vpop.f32.mrb[50].mxu1  ;;  %2132 = vmax.xlane.f32.xlu0 %v2131_v43 }
 0xb3d   :  { %v2114_v45 = vadd.f32 %v2113_v44, %v1912_v25  ;;  %v3141_v46 = vpop.f32.mrb[51].mxu1 }
 0xb3f   :  { %v2134_v47 = vsel %vm699_vm4, %v2114_v45, -inf }
 0xb40   :  { %v2118_v48 = vpop.f32.mrb[52].mxu1  ;;  %2135 = vmax.xlane.f32.xlu1 %v2134_v47  ;;  %2129 = vmax.xlane.f32.xlu0 %v2128_v33 }
 0xb41   :  { %v2119_v49 = vadd.f32 %v2118_v48, %v1913_v7  ;;  %v3144_v50 = vpop.f32.mrb[53].mxu1 }
 0xb43   :  { %v2137_v13 = vsel %vm699_vm4, %v2119_v49, -inf }
 0xb44   :  { %2138 = vmax.xlane.f32.xlu0 %v2137_v13 }
 0xb51   :  { %3366 = vrot.lane.b32.xlu1 %v3797_v0, %s3608_s28 }
 0xb91   :  { %v2124_v51 = vpop.xlane.xlu0 %2123 }
 0xb92   :  { %v2140_v52 = vsub.f32 %v2005_v21, %v2124_v51 }
 0xb94   :  { %v2146_v53 = vmul.f32 1.442695, %v2140_v52  ;;  %v2481_v52 = vld [vmem:[%s4331_s8] sm:$0xff] }
 0xb95   :  { %v2127_v54 = vpop.xlane.xlu1 %2126 }
 0xb96   :  { %3447 = vpow2.f32 %v2146_v53  ;;  %v2141_v55 = vsub.f32 %v2010_v28, %v2127_v54  ;;  %v2482_v53 = vld [vmem:[%s4331_s8 + $0x8] sm:$0xff] }
 0xb97   :  { %v3264_v54 = vpack.c.bf16 %v2482_v53, %v2481_v52 }
 0xb98   :  { %v2148_v56 = vmul.f32 1.442695, %v2141_v55  ;;  %v2483_v55 = vld [vmem:[%s4331_s8 + $0x10] sm:$0xff] }
 0xb9a   :  { %3449 = vpow2.f32 %v2148_v56 }
 0xba0   :  { %v4205_v57 = vpop.eup %3447 }
 0xba1   :  { %v2158_v59 = vsel %vm699_vm4, %v4205_v57, 0.0 }
 0xba2   :  { %2159 = vadd.xlane.f32.xlu1 %v2158_v59 }
 0xba4   :  { %v4209_v63 = vpop.eup %3449 }
 0xba5   :  { %v2161_v4 = vsel %vm699_vm4, %v4209_v63, 0.0 }
 0xba6   :  { %2162 = vadd.xlane.f32.xlu0 %v2161_v4 }
 0xbc9   :  { %v2133_v0 = vpop.xlane.xlu0 %2132 }
 0xbca   :  { %v2143_v11 = vsub.f32 %v2109_v32, %v2133_v0 }
 0xbcc   :  { %v2152_v15 = vmul.f32 1.442695, %v2143_v11 }
 0xbcd   :  { %v2136_v17 = vpop.xlane.xlu1 %2135  ;;  %v2130_v6 = vpop.xlane.xlu0 %2129 }
 0xbce   :  { %3451 = vpow2.f32 %v2152_v15  ;;  %v2144_v19 = vsub.f32 %v2114_v45, %v2136_v17  ;;  %v2142_v21 = vsub.f32 %v2015_v40, %v2130_v6 }
 0xbd0   :  { %v2154_v60 = vmul.f32 1.442695, %v2144_v19  ;;  %v2150_v25 = vmul.f32 1.442695, %v2142_v21 }
 0xbd1   :  { %v3367_v26 = vpop.permute.xlu1 %3366  ;;  %v2139_v27 = vpop.xlane.xlu0 %2138 }
 0xbd2   :  { %3453 = vpow2.f32 %v2154_v60  ;;  %v3369_v28 = vunpack.i.h.bf16 %v3367_v26  ;;  %v3368_v24 = vunpack.i.l.bf16 %v3367_v26  ;;  %v2145_v29 = vsub.f32 %v2119_v49, %v2139_v27 }
 0xbd3   :  { %3455 = vpow2.f32 %v2150_v25 }
 0xbd4   :  { %v3259_v30 = vpack.c.bf16 %v3369_v28, %v3368_v24  ;;  %v2156_v31 = vmul.f32 1.442695, %v2145_v29 }
 0xbd6   :  { %3457 = vpow2.f32 %v2156_v31  ;;  %3260 = vmatpush3.bf16.msra.mxu0 %v3259_v30 }
 0xbd7   :  { %3149 = vmatprep.subr.mxu0 %v3598_v3 }
 0xbd8   :  { %v3452_v35 = vpop.eup %3451 }
 0xbd9   :  { %v2167_v7 = vsel %vm699_vm4, %v3452_v35, 0.0 }
 0xbda   :  { %2168 = vadd.xlane.f32.xlu1 %v2167_v7 }
 0xbdc   :  { %v4215_v8 = vpop.eup %3453 }
 0xbdd   :  { %v3456_v32 = vpop.eup %3455  ;;  %v2170_v37 = vsel %vm699_vm4, %v4215_v8, 0.0 }
 0xbde   :  { %2171 = vadd.xlane.f32.xlu1 %v2170_v37  ;;  %v2164_v40 = vsel %vm699_vm4, %v3456_v32, 0.0 }
 0xbdf   :  { %2165 = vadd.xlane.f32.xlu0 %v2164_v40 }
 0xbe0   :  { %v3458_v43 = vpop.eup %3457 }
 0xbe1   :  { %v2173_v44 = vsel %vm699_vm4, %v3458_v43, 0.0 }
 0xbe3   :  { %2174 = vadd.xlane.f32.xlu0 %v2173_v44 }
 0xbef   :  { %2192 = vrot.lane.b32.xlu1 %v3799_v2, %s3608_s28 }
 0xbf3   :  { %2290 = vrot.lane.b32.xlu1 %v3807_v5, %s3608_s28 }
 0xbf7   :  { %2392 = vrot.lane.b32.xlu1 %v4073_v36, %s3592_s14 }
 0xbf9   :  { %3371 = vrot.lane.b32.xlu0 %v3816_v9, %s3608_s28 }
 0xbfb   :  { %2416 = vrot.lane.b32.xlu1 %v4187_v1, %s3609_s29 }
 0xbfd   :  { %2390 = vrot.lane.b32.xlu0 %v4071_v34, %s3592_s14 }
 0xbff   :  { %2396 = vrot.lane.b32.xlu1 %v4075_v39, %s3592_s14 }
 0xc01   :  { %2414 = vrot.lane.b32.xlu0 %v4185_v61, %s3609_s29 }
 0xc03   :  { %2420 = vrot.lane.b32.xlu1 %v4189_v10, %s3609_s29 }
 0xc05   :  { %2394 = vrot.lane.b32.xlu0 %v4079_v42, %s3592_s14 }
 0xc07   :  { %2400 = vrot.lane.b32.xlu1 %v4083_v58, %s3592_s14 }
 0xc09   :  { %2418 = vrot.lane.b32.xlu0 %v4193_v14, %s3609_s29 }
 0xc0b   :  { %2424 = vrot.lane.b32.xlu1 %v4197_v62, %s3609_s29 }
 0xc0d   :  { %2398 = vrot.lane.b32.xlu0 %v4077_v41, %s3592_s14 }
 0xc11   :  { %2422 = vrot.lane.b32.xlu0 %v4191_v12, %s3609_s29 }
 0xc2f   :  { %v2160_v2 = vpop.xlane.xlu1 %2159 }
 0xc30   :  { %3459 = vrcp.f32 %v2160_v2 }
 0xc33   :  { %v2163_v5 = vpop.xlane.xlu0 %2162 }
 0xc34   :  { %3461 = vrcp.f32 %v2163_v5 }
 0xc3a   :  { %v3460_v36 = vpop.eup %3459 }
 0xc3b   :  { %v2182_v42 = vmul.f32 %v3460_v36, %v4205_v57 }
 0xc3e   :  { %v3462_v61 = vpop.eup %3461 }
 0xc3f   :  { %v2183_v41 = vmul.f32 %v3462_v61, %v4209_v63 }
 0xc67   :  { %v2169_v9 = vpop.xlane.xlu1 %2168 }
 0xc6b   :  { %v2172_v34 = vpop.xlane.xlu1 %2171 }
 0xc6c   :  { %v2166_v39 = vpop.xlane.xlu0 %2165 }
 0xc6d   :  { %3463 = vrcp.f32 %v2166_v39 }
 0xc6e   :  { %3465 = vrcp.f32 %v2169_v9 }
 0xc6f   :  { %v2193_v58 = vpop.permute.xlu1 %2192  ;;  %3467 = vrcp.f32 %v2172_v34 }
 0xc70   :  { %v2175_v1 = vpop.xlane.xlu0 %2174  ;;  %3150 = vmatpush3.msra.mxu0 %v2193_v58 }
 0xc71   :  { %3152 = vmatmul.mubr.msk.f32.vlgmr.msra.gmra.mrb[48].mxu0 %vm699_vm4, %v2182_v42  ;;  %3469 = vrcp.f32 %v2175_v1  ;;  %3265 = vmatprep.subr.bf16.mxu0 %v3264_v54 }
 0xc72   :  { %3154 = vmatprep.mubr.msk.f32.mxu0 %vm3597_vm2, %v3598_v3  ;;  %3267 = vmatpush3.bf16.msra.mxu0 %v3264_v54 }
 0xc73   :  { %v2291_v48 = vpop.permute.xlu1 %2290 }
 0xc74   :  { %v3372_v10 = vpop.permute.xlu0 %3371 }
 0xc75   :  { %v3374_v12 = vunpack.i.h.bf16 %v3372_v10  ;;  %v3373_v14 = vunpack.i.l.bf16 %v3372_v10  ;;  %3155 = vmatmul.mubr.msk.f32.gmra.mrb[50].mxu0 %vm699_vm4, %v2183_v41 }
 0xc76   :  { %3157 = vmatprep.mubr.msk.f32.mxu0 %vm3597_vm2, %v3598_v3 }
 0xc77   :  { %v3464_v62 = vpop.eup %3463  ;;  %v3262_v45 = vpack.c.bf16 %v3374_v12, %v3373_v14  ;;  %v2393_v26 = vpop.permute.xlu1 %2392 }
 0xc78   :  { %v2184_v46 = vmul.f32 %v3464_v62, %v3456_v32  ;;  %v3466_v47 = vpop.eup %3465  ;;  %v2391_v25 = vpop.permute.xlu0 %2390  ;;  %v2457_v2 = vsel %vm230_vm1, %v3959_v18, %v2393_v26 }
 0xc79   :  { %3263 = vmatpush3.bf16.msra.mxu1 %v3262_v45  ;;  %v2185_v33 = vmul.f32 %v3466_v47, %v3452_v35  ;;  %v3468_v49 = vpop.eup %3467  ;;  %v2456_v32 = vsel %vm230_vm1, %v3957_v16, %v2391_v25 }
 0xc7a   :  { %3158 = vmatmul.mubr.msk.f32.gmra.mrb[52].mxu0 %vm699_vm4, %v2184_v46  ;;  %3164 = vmatprep.subr.mxu1 %v3598_v3  ;;  %v2186_v50 = vmul.f32 %v3468_v49, %v4215_v8 }
 0xc7b   :  { %v3470_v13 = vpop.eup %3469  ;;  %v2417_v28 = vpop.permute.xlu1 %2416 }
 0xc7c   :  { %v2187_v51 = vmul.f32 %v3470_v13, %v3458_v43  ;;  %v2415_v27 = vpop.permute.xlu0 %2414  ;;  %v2464_v5 = vsel %vm2462_vm5, %v2457_v2, %v2417_v28 }
 0xc7d   :  { %3165 = vmatpush3.msra.mxu1 %v2291_v48  ;;  %v2463_v37 = vsel %vm2462_vm5, %v2456_v32, %v2415_v27 }
 0xc7e   :  { %3167 = vmatmul.mubr.msk.f32.vlgmr.msra.gmra.mrb[54].mxu1 %vm699_vm4, %v2185_v33 }
 0xc7f   :  { %3169 = vmatprep.mubr.msk.f32.mxu1 %vm3597_vm2, %v3598_v3  ;;  %v2397_v29 = vpop.permute.xlu1 %2396 }
 0xc80   :  { %v2395_v24 = vpop.permute.xlu0 %2394  ;;  %v2459_v18 = vsel %vm230_vm1, %v3961_v20, %v2397_v29 }
 0xc81   :  { %v2458_v16 = vsel %vm230_vm1, %v3965_v23, %v2395_v24 }
 0xc82   :  { %3170 = vmatmul.mubr.msk.f32.gmra.mrb[56].mxu1 %vm699_vm4, %v2186_v50 }
 0xc83   :  { %3172 = vmatprep.mubr.msk.f32.mxu1 %vm3597_vm2, %v3598_v3  ;;  %v2484_v3 = vld [vmem:[%s4331_s8 + $0x18] sm:$0xff]  ;;  %v2421_v31 = vpop.permute.xlu1 %2420 }
 0xc84   :  { %v3268_v56 = vpack.c.bf16 %v2484_v3, %v2483_v55  ;;  %v2419_v30 = vpop.permute.xlu0 %2418  ;;  %v2466_v58 = vsel %vm2462_vm5, %v2459_v18, %v2421_v31 }
 0xc85   :  { %v2465_v36 = vsel %vm2462_vm5, %v2458_v16, %v2419_v30 }
 0xc86   :  { %3173 = vmatmul.mubr.msk.f32.gmra.mrb[58].mxu1 %vm699_vm4, %v2187_v51  ;;  %3269 = vmatprep.subr.bf16.mxu0 %v3268_v56 }
 0xc87   :  { %3271 = vmatpush3.bf16.msra.mxu0 %v3268_v56  ;;  %v2401_v7 = vpop.permute.xlu1 %2400 }
 0xc88   :  { %v2399_v35 = vpop.permute.xlu0 %2398  ;;  %v2461_v20 = vsel %vm230_vm1, %v3969_v38, %v2401_v7 }
 0xc89   :  { %v2460_v23 = vsel %vm230_vm1, %v3963_v22, %v2399_v35  ;;  %v2756_v22 = vld [vmem:[%s4332_s9] ss:$0 sm:$0xff]  ;;  %s3559_s9 = scalar_lea.vmem %s2644_s17, 768 }
 0xc8a   :  { %p3560_p4 = scmp.ne.s32.totalorder %s2644_s17, %s3559_s9  ;;  %p3565_p6 = scmp.lt.s32.totalorder %s3559_s9, %s3559_s9 }
 0xc8b   :  { %v2425_v40 = vpop.permute.xlu1 %2424 }
 0xc8c   :  { %v2423_v8 = vpop.permute.xlu0 %2422  ;;  %v2468_v14 = vsel %vm2462_vm5, %v2461_v20, %v2425_v40  ;;  %p3566_p7 = por %p3565_p6, %p3564_p5 }
 0xc8d   :  { %v2467_v41 = vsel %vm2462_vm5, %v2460_v23, %v2423_v8 }
 0xc8e   :  { %p3567_p8 = pnand %p3566_p7, %p3560_p4 }
 0xd44   :  { %v2272_v57 = vpop.f32.mrb[48].mxu0 }
 0xd45   :  { %2438 = vrot.lane.b32.xlu0 %v2272_v57, %s3610_s12  ;;  %v3153_v59 = vpop.f32.mrb[49].mxu0 }
 0xd48   :  { %v2277_v63 = vpop.f32.mrb[50].mxu0 }
 0xd49   :  { %2440 = vrot.lane.b32.xlu1 %v2277_v63, %s3610_s12  ;;  %v3156_v4 = vpop.f32.mrb[51].mxu0 }
 0xd4d   :  { %v2282_v0 = vpop.f32.mrb[52].mxu0 }
 0xd4e   :  { %2442 = vrot.lane.b32.xlu0 %v2282_v0, %s3610_s12  ;;  %v3159_v11 = vpop.f32.mrb[53].mxu0 }
 0xd51   :  { %v2370_v15 = vpop.f32.mrb[54].mxu1 }
 0xd52   :  { %v3168_v17 = vpop.f32.mrb[55].mxu1  ;;  %2444 = vrot.lane.b32.xlu1 %v2370_v15, %s3610_s12 }
 0xd55   :  { %v2375_v6 = vpop.f32.mrb[56].mxu1 }
 0xd56   :  { %v3171_v19 = vpop.f32.mrb[57].mxu1  ;;  %2446 = vrot.lane.b32.xlu0 %v2375_v6, %s3610_s12 }
 0xd59   :  { %v2380_v21 = vpop.f32.mrb[58].mxu1 }
 0xd5a   :  { %v3174_v60 = vpop.f32.mrb[59].mxu1  ;;  %2448 = vrot.lane.b32.xlu1 %v2380_v21, %s3610_s12 }
 0xdb7   :  { %v2439_v43 = vpop.permute.xlu0 %2438 }
 0xdb8   :  { %v2469_v44 = vsel %vm699_vm4, %v2463_v37, %v2439_v43 }
 0xdb9   :  { %3183 = vmatprep.mubr.msk.f32.mxu0 %vm108_vm0, %v2469_v44 }
 0xdbb   :  { %v2441_v9 = vpop.permute.xlu1 %2440 }
 0xdbc   :  { %v2470_v34 = vsel %vm699_vm4, %v2464_v5, %v2441_v9 }
 0xdbd   :  { %3184 = vmatmul.mubr.msk.f32.vlgmr.msra.gmra.mrb[54].mxu0 %vm108_vm0, %v2470_v34 }
 0xdc0   :  { %v2443_v39 = vpop.permute.xlu0 %2442 }
 0xdc1   :  { %v2471_v42 = vsel %vm699_vm4, %v2465_v36, %v2443_v39 }
 0xdc2   :  { %3186 = vmatprep.mubr.msk.f32.mxu0 %vm108_vm0, %v2471_v42 }
 0xdc4   :  { %v2445_v61 = vpop.permute.xlu1 %2444 }
 0xdc5   :  { %v2472_v1 = vsel %vm699_vm4, %v2466_v58, %v2445_v61 }
 0xdc6   :  { %3187 = vmatmul.mubr.msk.f32.gmra.mrb[56].mxu0 %vm108_vm0, %v2472_v1 }
 0xdc8   :  { %v2447_v10 = vpop.permute.xlu0 %2446 }
 0xdc9   :  { %v2473_v12 = vsel %vm699_vm4, %v2467_v41, %v2447_v10 }
 0xdca   :  { %3189 = vmatprep.mubr.msk.f32.mxu0 %vm108_vm0, %v2473_v12 }
 0xdcc   :  { %v2449_v62 = vpop.permute.xlu1 %2448 }
 0xdcd   :  { %v2474_v45 = vsel %vm699_vm4, %v2468_v14, %v2449_v62 }
 0xdce   :  { %3190 = vmatmul.mubr.msk.f32.gmra.mrb[58].mxu0 %vm108_vm0, %v2474_v45 }
 0xe90   :  { %v3185_v46 = vpop.f32.mrb[54].mxu0 }
 0xe91   :  { %v2627_v47 = vadd.f32 %v3185_v46, %v2756_v22  ;;  %v2569_v33 = vpop.f32.mrb[55].mxu0 }
 0xe92   :  { %v2626_v48 = vadd.f32 %v2756_v22, %v2569_v33 }
 0xe93   :  { %2633 = vst [vmem:[#allocation12 + $0x8] sm:$0xff] %v2627_v47 }
 0xe94   :  { %2632 = vst [vmem:[#allocation12] sm:$0xff] %v2626_v48 }
 0xe99   :  { %v3188_v49 = vpop.f32.mrb[56].mxu0 }
 0xe9a   :  { %v2629_v50 = vadd.f32 %v3188_v49, %v2756_v22  ;;  %v2579_v38 = vpop.f32.mrb[57].mxu0 }
 0xe9b   :  { %v2628_v13 = vadd.f32 %v2756_v22, %v2579_v38 }
 0xe9c   :  { %2635 = vst [vmem:[#allocation12 + $0x18] sm:$0xff] %v2629_v50 }
 0xe9d   :  { %2634 = vst [vmem:[#allocation12 + $0x10] sm:$0xff] %v2628_v13 }
 0xea1   :  { %v3191_v51 = vpop.f32.mrb[58].mxu0 }
 0xea2   :  { %v2631_v52 = vadd.f32 %v3191_v51, %v2756_v22  ;;  %v2589_v53 = vpop.f32.mrb[59].mxu0 }
 0xea3   :  { %v2630_v54 = vadd.f32 %v2756_v22, %v2589_v53 }
 0xea4   :  { %2637 = vst [vmem:[#allocation12 + $0x28] sm:$0xff] %v2631_v52 }
 0xea5   :  { %2636 = vst [vmem:[#allocation12 + $0x20] sm:$0xff] %v2630_v54 }
 0xea6   :  { %3570 = shalt.err (!%p3567_p8)
}
 0xea7   :  { %s3571_s4 = scalar_lea.hbm %s4333_s10, 768 }
 0xea8   :  { %p3572_p9 = scmp.ne.s32.totalorder %s4333_s10, %s3571_s4  ;;  %p3575_p10 = scmp.lt.u32.totalorder %s3571_s4, %s4333_s10 }
 0xeaa   :  { %p3577_p11 = pnand %p3575_p10, %p3572_p9 }
 0xeac   :  { %3580 = shalt.err (!%p3577_p11)
}
 0xead   :  { %2649 = dma.vmem_to_hbm [thread:$0]  %s2644_s17, 768, %s4333_s10, [#allocation6], %s3591_s3, %s3591_s3, %s3592_s14  }
 0xeae   :  { %3587 = dma.done.wait [#allocation6], 768  }
 0xeaf   :  { %3588 = vsyncadd [#allocation6], 4294966528 }
 0xeb0   :  { %2653 = vsyncpa [#allocation5], 1 }
 0xeb1   :  { %2654 = vsyncpa [#allocation8], 1 }
 0xeb2   :  { %2655 = vsyncpa [#allocation11], 1 }
 0xeb3   :  { %2656 = vsyncpa [#allocation6], 1 }

</bundles_post_ra>
